<compile_context>
chip_gen: v5e
topology: v5e:2x2
jax: 0.10.0
libtpu: 0.0.40
codegen_flags: <defaults>
</compile_context>

<pallas_src>
import math

import jax
import jax.numpy as jnp
from jax.experimental import pallas as pl
from jax.experimental.pallas import tpu as pltpu

# ---------------- config (small synthetic DistilBERT) ----------------
VOCAB = 100        # synthetic vocab
MAX_POS = 16       # max position embeddings
B = 2              # batch
S = 8              # sequence length
H = 32             # hidden size (768 in real DistilBERT)
NH = 4             # attention heads
HD = H // NH       # head dim
FF = 64            # FFN intermediate size
NLAYERS = 2        # encoder layers
EPS = 1e-12        # DistilBERT LayerNorm eps
DTYPE = jnp.float32
BS = B * S


# ---------------- kernel ----------------
def _layernorm(x, gamma, beta):
    mu = jnp.mean(x, axis=-1, keepdims=True)
    var = jnp.mean((x - mu) ** 2, axis=-1, keepdims=True)
    return (x - mu) * jax.lax.rsqrt(var + EPS) * gamma + beta


def fused_forward_kernel(x0_ref, bias_ref, emb_g_ref, emb_b_ref,
                         wqkv_ref, bqkv_ref, wo_ref, bo_ref,
                         g1_ref, be1_ref, w1_ref, b1_ref,
                         w2_ref, b2_ref, g2_ref, be2_ref,
                         wp_ref, bp_ref,
                         o_ref, h_ref):
    """One grid step == one encoder layer; hidden state resident in VMEM."""
    layer = pl.program_id(0)

    # ----- step 0: embedding LayerNorm initializes the resident hidden state
    @pl.when(layer == 0)
    def _():
        x0 = x0_ref[...].astype(jnp.float32)                       # (B*S, H)
        h_ref[...] = _layernorm(x0, emb_g_ref[...], emb_b_ref[...])

    x = h_ref[...]                                                 # (B*S, H)
    bias = bias_ref[...]                                           # (B, S) additive

    # Fused QKV projection: one (B*S, H) @ (H, 3H) matmul.
    qkv = jnp.dot(x, wqkv_ref[0],
                  preferred_element_type=jnp.float32) + bqkv_ref[0]
    wo = wo_ref[0]                                                 # (H, H)

    scale = jnp.float32(1.0 / math.sqrt(HD))

    # Multi-head attention: batch folded into each einsum, heads statically
    # unrolled.  Output projection is accumulated inside the head loop, so no
    # lane-axis concatenate is needed.
    attn = jnp.zeros((BS, H), jnp.float32)
    for h in range(NH):
        qh = qkv[:, h * HD:(h + 1) * HD].reshape(B, S, HD)
        kh = qkv[:, H + h * HD:H + (h + 1) * HD].reshape(B, S, HD)
        vh = qkv[:, 2 * H + h * HD:2 * H + (h + 1) * HD].reshape(B, S, HD)
        s = jnp.einsum('bqd,bkd->bqk', qh, kh,
                       preferred_element_type=jnp.float32) * scale
        s = s + bias[:, None, :]                                   # mask keys
        m = jnp.max(s, axis=-1, keepdims=True)
        p = jnp.exp(s - m)
        p = p * pl.reciprocal(jnp.sum(p, axis=-1, keepdims=True), approx=True)
        ctx_h = jnp.einsum('bqk,bkd->bqd', p, vh,
                           preferred_element_type=jnp.float32).reshape(BS, HD)
        attn = attn + jnp.dot(ctx_h, wo[h * HD:(h + 1) * HD, :],
                              preferred_element_type=jnp.float32)
    attn = attn + bo_ref[0]

    h1 = _layernorm(x + attn, g1_ref[0], be1_ref[0])

    # FFN.  TODO(synk): real DistilBERT uses exact erf-GELU; tanh-approx here.
    f = jnp.dot(h1, w1_ref[0], preferred_element_type=jnp.float32) + b1_ref[0]
    f = jax.nn.gelu(f, approximate=True)
    f = jnp.dot(f, w2_ref[0], preferred_element_type=jnp.float32) + b2_ref[0]

    h2 = _layernorm(h1 + f, g2_ref[0], be2_ref[0])
    h_ref[...] = h2

    # ----- last step: CLS slice -> Linear(H, 1) -> sigmoid -----
    @pl.when(layer == pl.num_programs(0) - 1)
    def _():
        cls = jnp.concatenate(
            [h2[b * S:b * S + 1, :] for b in range(B)], axis=0)    # (B, H)
        logit = jnp.dot(cls, wp_ref[...],
                        preferred_element_type=jnp.float32) + bp_ref[...]
        o_ref[...] = jax.nn.sigmoid(logit).astype(o_ref.dtype)


# ---------------- pallas_call wrapper ----------------
def _inv(shape):
    # layer-invariant input: same block every grid step (stays VMEM-resident)
    n = len(shape)
    return pl.BlockSpec(shape, lambda l, _n=n: (0,) * _n)


def _per_layer(shape2d):
    # stacked per-layer weight: leading axis indexed by the layer grid step
    return pl.BlockSpec((1,) + shape2d, lambda l: (l, 0, 0))


@jax.jit
def custom_distilbert_forward(input_ids, attention_mask, params):
    # Embedding gather is glue; everything else runs inside the fused kernel.
    positions = jnp.arange(S)
    x0 = params["word_emb"][input_ids] + params["pos_emb"][positions][None, :, :]
    x0 = x0.astype(DTYPE).reshape(BS, H)
    # Additive attention-mask bias: 0 for real tokens, -1e30 for padding.
    mask_bias = (1.0 - attention_mask.astype(jnp.float32)) * jnp.float32(-1e30)

    out = pl.pallas_call(
        fused_forward_kernel,
        out_shape=jax.ShapeDtypeStruct((B, 1), DTYPE),
        grid=(NLAYERS,),
        in_specs=[
            _inv((BS, H)),                                   # x0 (embeddings)
            _inv((B, S)),                                    # attention mask bias
            _inv((1, H)), _inv((1, H)),                      # emb LN gamma/beta
            _per_layer((H, 3 * H)), _per_layer((1, 3 * H)),  # wqkv, bqkv
            _per_layer((H, H)), _per_layer((1, H)),          # wo, bo
            _per_layer((1, H)), _per_layer((1, H)),          # ln1 gamma/beta
            _per_layer((H, FF)), _per_layer((1, FF)),        # ffn w1, b1
            _per_layer((FF, H)), _per_layer((1, H)),         # ffn w2, b2
            _per_layer((1, H)), _per_layer((1, H)),          # ln2 gamma/beta
            _inv((H, 1)), _inv((1, 1)),                      # pred w, b
        ],
        out_specs=_inv((B, 1)),
        scratch_shapes=[pltpu.VMEM((BS, H), jnp.float32)],   # resident hidden
        compiler_params=pltpu.CompilerParams(
            dimension_semantics=("arbitrary",)),
    )(x0, mask_bias, params["emb_ln_g"], params["emb_ln_b"],
      params["wqkv"], params["bqkv"], params["wo"], params["bo"],
      params["ln1_g"], params["ln1_b"], params["w1"], params["b1"],
      params["w2"], params["b2"], params["ln2_g"], params["ln2_b"],
      params["w_pred"], params["b_pred"])
    return jnp.squeeze(out, axis=-1)                         # (B,) like torch


# ---------------- parameter init (deterministic, synthetic) ----------------
def init_params(key):
    def nrm(k, shape, scale=0.02):
        return (scale * jax.random.normal(k, shape)).astype(DTYPE)

    ks = jax.random.split(key, 4)
    params = {
        "word_emb": nrm(ks[0], (VOCAB, H)),
        "pos_emb": nrm(ks[1], (MAX_POS, H)),
        "emb_ln_g": jnp.ones((1, H), DTYPE),
        "emb_ln_b": jnp.zeros((1, H), DTYPE),
        "w_pred": nrm(ks[2], (H, 1)),
        "b_pred": jnp.zeros((1, 1), DTYPE),
    }

    lkeys = iter(jax.random.split(ks[3], NLAYERS * 6))
    wqkv_l, wo_l, w1_l, w2_l = [], [], [], []
    for _ in range(NLAYERS):
        wq = nrm(next(lkeys), (H, H))
        wk = nrm(next(lkeys), (H, H))
        wv = nrm(next(lkeys), (H, H))
        wqkv_l.append(jnp.concatenate([wq, wk, wv], axis=1))  # (H, 3H) fused
        wo_l.append(nrm(next(lkeys), (H, H)))
        w1_l.append(nrm(next(lkeys), (H, FF)))
        w2_l.append(nrm(next(lkeys), (FF, H)))

    params.update({
        "wqkv": jnp.stack(wqkv_l),                           # (L, H, 3H)
        "bqkv": jnp.zeros((NLAYERS, 1, 3 * H), DTYPE),
        "wo": jnp.stack(wo_l),                               # (L, H, H)
        "bo": jnp.zeros((NLAYERS, 1, H), DTYPE),
        "ln1_g": jnp.ones((NLAYERS, 1, H), DTYPE),
        "ln1_b": jnp.zeros((NLAYERS, 1, H), DTYPE),
        "w1": jnp.stack(w1_l),                               # (L, H, FF)
        "b1": jnp.zeros((NLAYERS, 1, FF), DTYPE),
        "w2": jnp.stack(w2_l),                               # (L, FF, H)
        "b2": jnp.zeros((NLAYERS, 1, H), DTYPE),
        "ln2_g": jnp.ones((NLAYERS, 1, H), DTYPE),
        "ln2_b": jnp.zeros((NLAYERS, 1, H), DTYPE),
    })
    return params


if __name__ == "__main__":
    key = jax.random.PRNGKey(0)
    pkey, ikey = jax.random.split(key)

    params = init_params(pkey)
    input_ids = jax.random.randint(ikey, (B, S), minval=0, maxval=VOCAB)
    # batch 0: no padding; batch 1: last two tokens padded.
    attention_mask = jnp.array(
        [[1, 1, 1, 1, 1, 1, 1, 1],
         [1, 1, 1, 1, 1, 1, 0, 0]], dtype=jnp.int32)

    preds = custom_distilbert_forward(input_ids, attention_mask, params)
    preds = jax.block_until_ready(preds)

    assert preds.shape == (B,), preds.shape
    assert bool(jnp.all(jnp.isfinite(preds)))
    assert bool(jnp.all((preds >= 0.0) & (preds <= 1.0)))
    print("KERNEL_OK")
</pallas_src>

<mosaic_0001>
module attributes {stable_mosaic.version = 11 : i64} {
  func.func @fused_forward_kernel(%arg0: i32, %arg1: memref<16x32xf32, #tpu.memory_space<vmem>>, %arg2: memref<2x8xf32, #tpu.memory_space<vmem>>, %arg3: memref<1x32xf32, #tpu.memory_space<vmem>>, %arg4: memref<1x32xf32, #tpu.memory_space<vmem>>, %arg5: memref<1x32x96xf32, #tpu.memory_space<vmem>>, %arg6: memref<1x1x96xf32, #tpu.memory_space<vmem>>, %arg7: memref<1x32x32xf32, #tpu.memory_space<vmem>>, %arg8: memref<1x1x32xf32, #tpu.memory_space<vmem>>, %arg9: memref<1x1x32xf32, #tpu.memory_space<vmem>>, %arg10: memref<1x1x32xf32, #tpu.memory_space<vmem>>, %arg11: memref<1x32x64xf32, #tpu.memory_space<vmem>>, %arg12: memref<1x1x64xf32, #tpu.memory_space<vmem>>, %arg13: memref<1x64x32xf32, #tpu.memory_space<vmem>>, %arg14: memref<1x1x32xf32, #tpu.memory_space<vmem>>, %arg15: memref<1x1x32xf32, #tpu.memory_space<vmem>>, %arg16: memref<1x1x32xf32, #tpu.memory_space<vmem>>, %arg17: memref<32x1xf32, #tpu.memory_space<vmem>>, %arg18: memref<1x1xf32, #tpu.memory_space<vmem>>, %arg19: memref<2x1xf32, #tpu.memory_space<vmem>>, %arg20: memref<16x32xf32, #tpu.memory_space<vmem>>) attributes {dimension_semantics = [#tpu.dimension_semantics<arbitrary>], iteration_bounds = array<i64: 2>, scalar_prefetch = 0 : i64, scratch_operands = 1 : i64, tpu.core_type = #tpu.core_type<tc>, window_params = [{pipeline_mode = #tpu.pipeline_mode<synchronous>, transform_indices = @transform_0, window_bounds = array<i64: 16, 32>}, {pipeline_mode = #tpu.pipeline_mode<synchronous>, transform_indices = @transform_1, window_bounds = array<i64: 2, 8>}, {pipeline_mode = #tpu.pipeline_mode<synchronous>, transform_indices = @transform_2, window_bounds = array<i64: 1, 32>}, {pipeline_mode = #tpu.pipeline_mode<synchronous>, transform_indices = @transform_3, window_bounds = array<i64: 1, 32>}, {transform_indices = @transform_4, window_bounds = array<i64: 1, 32, 96>}, {transform_indices = @transform_5, window_bounds = array<i64: 1, 1, 96>}, {transform_indices = @transform_6, window_bounds = array<i64: 1, 32, 32>}, {transform_indices = @transform_7, window_bounds = array<i64: 1, 1, 32>}, {transform_indices = @transform_8, window_bounds = array<i64: 1, 1, 32>}, {transform_indices = @transform_9, window_bounds = array<i64: 1, 1, 32>}, {transform_indices = @transform_10, window_bounds = array<i64: 1, 32, 64>}, {transform_indices = @transform_11, window_bounds = array<i64: 1, 1, 64>}, {transform_indices = @transform_12, window_bounds = array<i64: 1, 64, 32>}, {transform_indices = @transform_13, window_bounds = array<i64: 1, 1, 32>}, {transform_indices = @transform_14, window_bounds = array<i64: 1, 1, 32>}, {transform_indices = @transform_15, window_bounds = array<i64: 1, 1, 32>}, {pipeline_mode = #tpu.pipeline_mode<synchronous>, transform_indices = @transform_16, window_bounds = array<i64: 32, 1>}, {pipeline_mode = #tpu.pipeline_mode<synchronous>, transform_indices = @transform_17, window_bounds = array<i64: 1, 1>}, {pipeline_mode = #tpu.pipeline_mode<synchronous>, transform_indices = @transform_18, window_bounds = array<i64: 2, 1>}]} {
    %c0_i32 = arith.constant 0 : i32
    %0 = arith.cmpi eq, %arg0, %c0_i32 : i32
    %1 = arith.extui %0 : i1 to i32
    %c0_i32_0 = arith.constant 0 : i32
    %2 = arith.cmpi ne, %1, %c0_i32_0 : i32
    scf.if %2 {
      %c0_84 = arith.constant 0 : index
      %c0_85 = arith.constant 0 : index
      %212 = vector.load %arg1[%c0_84, %c0_85] : memref<16x32xf32, #tpu.memory_space<vmem>>, vector<16x32xf32>
      %c0_86 = arith.constant 0 : index
      %c0_87 = arith.constant 0 : index
      %213 = vector.load %arg3[%c0_86, %c0_87] : memref<1x32xf32, #tpu.memory_space<vmem>>, vector<1x32xf32>
      %c0_88 = arith.constant 0 : index
      %c0_89 = arith.constant 0 : index
      %214 = vector.load %arg4[%c0_88, %c0_89] : memref<1x32xf32, #tpu.memory_space<vmem>>, vector<1x32xf32>
      %cst_90 = arith.constant dense<0.000000e+00> : vector<16xf32>
      %215 = vector.multi_reduction <add>, %212, %cst_90 [1] : vector<16x32xf32> to vector<16xf32>
      %216 = vector.shape_cast %215 : vector<16xf32> to vector<16x1xf32>
      %cst_91 = arith.constant 3.200000e+01 : f32
      %217 = vector.broadcast %cst_91 : f32 to vector<16x1xf32>
      %218 = arith.divf %216, %217 : vector<16x1xf32>
      %219 = vector.broadcast %218 : vector<16x1xf32> to vector<16x32xf32>
      %220 = arith.subf %212, %219 : vector<16x32xf32>
      %221 = arith.mulf %220, %220 : vector<16x32xf32>
      %cst_92 = arith.constant dense<0.000000e+00> : vector<16xf32>
      %222 = vector.multi_reduction <add>, %221, %cst_92 [1] : vector<16x32xf32> to vector<16xf32>
      %223 = vector.shape_cast %222 : vector<16xf32> to vector<16x1xf32>
      %cst_93 = arith.constant 3.200000e+01 : f32
      %224 = vector.broadcast %cst_93 : f32 to vector<16x1xf32>
      %225 = arith.divf %223, %224 : vector<16x1xf32>
      %226 = vector.broadcast %218 : vector<16x1xf32> to vector<16x32xf32>
      %227 = arith.subf %212, %226 : vector<16x32xf32>
      %cst_94 = arith.constant 9.99999996E-13 : f32
      %228 = vector.broadcast %cst_94 : f32 to vector<16x1xf32>
      %229 = arith.addf %225, %228 : vector<16x1xf32>
      %230 = math.rsqrt %229 : vector<16x1xf32>
      %231 = vector.broadcast %230 : vector<16x1xf32> to vector<16x32xf32>
      %232 = arith.mulf %227, %231 : vector<16x32xf32>
      %233 = vector.broadcast %213 : vector<1x32xf32> to vector<16x32xf32>
      %234 = arith.mulf %232, %233 : vector<16x32xf32>
      %235 = vector.broadcast %214 : vector<1x32xf32> to vector<16x32xf32>
      %236 = arith.addf %234, %235 : vector<16x32xf32>
      %c0_95 = arith.constant 0 : index
      %c0_96 = arith.constant 0 : index
      %237 = vector.load %arg20[%c0_95, %c0_96] : memref<16x32xf32, #tpu.memory_space<vmem>>, vector<16x32xf32>
      tpu.vector_store %arg20[%c0_95, %c0_96], %236 {strides = array<i32>} : memref<16x32xf32, #tpu.memory_space<vmem>>, vector<16x32xf32>,
    } else {
    }
    %c0 = arith.constant 0 : index
    %c0_1 = arith.constant 0 : index
    %3 = vector.load %arg20[%c0, %c0_1] : memref<16x32xf32, #tpu.memory_space<vmem>>, vector<16x32xf32>
    %c0_2 = arith.constant 0 : index
    %c0_3 = arith.constant 0 : index
    %4 = vector.load %arg2[%c0_2, %c0_3] : memref<2x8xf32, #tpu.memory_space<vmem>>, vector<2x8xf32>
    %c0_4 = arith.constant 0 : index
    %c0_5 = arith.constant 0 : index
    %c0_6 = arith.constant 0 : index
    %5 = vector.load %arg5[%c0_4, %c0_5, %c0_6] : memref<1x32x96xf32, #tpu.memory_space<vmem>>, vector<1x32x96xf32>
    %6 = vector.shape_cast %5 : vector<1x32x96xf32> to vector<32x96xf32>
    %cst = arith.constant dense<0.000000e+00> : vector<16x96xf32>
    %7 = tpu.matmul %3, %6, %cst {dimension_numbers = #tpu.dot_dimension_numbers<[1], [0], [0], [1], [0, 0, 1, 1], [], []>} : vector<16x32xf32>, vector<32x96xf32>, vector<16x96xf32> -> vector<16x96xf32>
    %c0_7 = arith.constant 0 : index
    %c0_8 = arith.constant 0 : index
    %c0_9 = arith.constant 0 : index
    %8 = vector.load %arg6[%c0_7, %c0_8, %c0_9] : memref<1x1x96xf32, #tpu.memory_space<vmem>>, vector<1x1x96xf32>
    %9 = vector.shape_cast %8 : vector<1x1x96xf32> to vector<1x96xf32>
    %10 = vector.broadcast %9 : vector<1x96xf32> to vector<16x96xf32>
    %11 = arith.addf %7, %10 : vector<16x96xf32>
    %c0_10 = arith.constant 0 : index
    %c0_11 = arith.constant 0 : index
    %c0_12 = arith.constant 0 : index
    %12 = vector.load %arg7[%c0_10, %c0_11, %c0_12] : memref<1x32x32xf32, #tpu.memory_space<vmem>>, vector<1x32x32xf32>
    %13 = vector.shape_cast %12 : vector<1x32x32xf32> to vector<32x32xf32>
    %cst_13 = arith.constant 0.000000e+00 : f32
    %14 = vector.broadcast %cst_13 : f32 to vector<16x32xf32>
    %15 = vector.extract_strided_slice %11 {offsets = [0, 0], sizes = [16, 8], strides = [1, 1]} : vector<16x96xf32> to vector<16x8xf32>
    %16 = vector.shape_cast %15 : vector<16x8xf32> to vector<2x8x8xf32>
    %17 = vector.extract_strided_slice %11 {offsets = [0, 32], sizes = [16, 8], strides = [1, 1]} : vector<16x96xf32> to vector<16x8xf32>
    %18 = vector.shape_cast %17 : vector<16x8xf32> to vector<2x8x8xf32>
    %19 = vector.extract_strided_slice %11 {offsets = [0, 64], sizes = [16, 8], strides = [1, 1]} : vector<16x96xf32> to vector<16x8xf32>
    %20 = vector.shape_cast %19 : vector<16x8xf32> to vector<2x8x8xf32>
    "tpu.trace_start"() <{level = 10 : i32, message = "bqd,bkd->bqk"}> : () -> ()
    %cst_14 = arith.constant dense<0.000000e+00> : vector<2x8x8xf32>
    %21 = tpu.matmul %16, %18, %cst_14 {dimension_numbers = #tpu.dot_dimension_numbers<[2], [2], [1], [1], [0, 0, 0, 1, 1, 1], [0], [0]>} : vector<2x8x8xf32>, vector<2x8x8xf32>, vector<2x8x8xf32> -> vector<2x8x8xf32>
    "tpu.trace_stop"() : () -> ()
    %cst_15 = arith.constant 0.353553385 : f32
    %22 = vector.broadcast %cst_15 : f32 to vector<2x8x8xf32>
    %23 = arith.mulf %21, %22 : vector<2x8x8xf32>
    %24 = vector.shape_cast %4 : vector<2x8xf32> to vector<2x1x8xf32>
    %25 = vector.broadcast %24 : vector<2x1x8xf32> to vector<2x8x8xf32>
    %26 = arith.addf %23, %25 : vector<2x8x8xf32>
    %cst_16 = arith.constant dense<0xFF800000> : vector<2x8xf32>
    %27 = vector.multi_reduction <maximumf>, %26, %cst_16 [2] : vector<2x8x8xf32> to vector<2x8xf32>
    %28 = vector.shape_cast %27 : vector<2x8xf32> to vector<2x8x1xf32>
    %29 = vector.broadcast %28 : vector<2x8x1xf32> to vector<2x8x8xf32>
    %30 = arith.subf %26, %29 : vector<2x8x8xf32>
    %31 = math.exp %30 : vector<2x8x8xf32>
    %cst_17 = arith.constant dense<0.000000e+00> : vector<2x8xf32>
    %32 = vector.multi_reduction <add>, %31, %cst_17 [2] : vector<2x8x8xf32> to vector<2x8xf32>
    %33 = vector.shape_cast %32 : vector<2x8xf32> to vector<2x8x1xf32>
    %34 = tpu.reciprocal %33 {approx = true} : vector<2x8x1xf32> -> vector<2x8x1xf32>
    %35 = vector.broadcast %34 : vector<2x8x1xf32> to vector<2x8x8xf32>
    %36 = arith.mulf %31, %35 : vector<2x8x8xf32>
    "tpu.trace_start"() <{level = 10 : i32, message = "bqk,bkd->bqd"}> : () -> ()
    %cst_18 = arith.constant dense<0.000000e+00> : vector<2x8x8xf32>
    %37 = tpu.matmul %36, %20, %cst_18 {dimension_numbers = #tpu.dot_dimension_numbers<[2], [1], [1], [2], [0, 0, 0, 1, 1, 2], [0], [0]>} : vector<2x8x8xf32>, vector<2x8x8xf32>, vector<2x8x8xf32> -> vector<2x8x8xf32>
    "tpu.trace_stop"() : () -> ()
    %38 = vector.shape_cast %37 : vector<2x8x8xf32> to vector<16x8xf32>
    %39 = vector.extract_strided_slice %13 {offsets = [0, 0], sizes = [8, 32], strides = [1, 1]} : vector<32x32xf32> to vector<8x32xf32>
    %cst_19 = arith.constant dense<0.000000e+00> : vector<16x32xf32>
    %40 = tpu.matmul %38, %39, %cst_19 {dimension_numbers = #tpu.dot_dimension_numbers<[1], [0], [0], [1], [0, 0, 1, 1], [], []>} : vector<16x8xf32>, vector<8x32xf32>, vector<16x32xf32> -> vector<16x32xf32>
    %41 = arith.addf %14, %40 : vector<16x32xf32>
    %42 = vector.extract_strided_slice %11 {offsets = [0, 8], sizes = [16, 8], strides = [1, 1]} : vector<16x96xf32> to vector<16x8xf32>
    %43 = vector.shape_cast %42 : vector<16x8xf32> to vector<2x8x8xf32>
    %44 = vector.extract_strided_slice %11 {offsets = [0, 40], sizes = [16, 8], strides = [1, 1]} : vector<16x96xf32> to vector<16x8xf32>
    %45 = vector.shape_cast %44 : vector<16x8xf32> to vector<2x8x8xf32>
    %46 = vector.extract_strided_slice %11 {offsets = [0, 72], sizes = [16, 8], strides = [1, 1]} : vector<16x96xf32> to vector<16x8xf32>
    %47 = vector.shape_cast %46 : vector<16x8xf32> to vector<2x8x8xf32>
    "tpu.trace_start"() <{level = 10 : i32, message = "bqd,bkd->bqk"}> : () -> ()
    %cst_20 = arith.constant dense<0.000000e+00> : vector<2x8x8xf32>
    %48 = tpu.matmul %43, %45, %cst_20 {dimension_numbers = #tpu.dot_dimension_numbers<[2], [2], [1], [1], [0, 0, 0, 1, 1, 1], [0], [0]>} : vector<2x8x8xf32>, vector<2x8x8xf32>, vector<2x8x8xf32> -> vector<2x8x8xf32>
    "tpu.trace_stop"() : () -> ()
    %cst_21 = arith.constant 0.353553385 : f32
    %49 = vector.broadcast %cst_21 : f32 to vector<2x8x8xf32>
    %50 = arith.mulf %48, %49 : vector<2x8x8xf32>
    %51 = vector.shape_cast %4 : vector<2x8xf32> to vector<2x1x8xf32>
    %52 = vector.broadcast %51 : vector<2x1x8xf32> to vector<2x8x8xf32>
    %53 = arith.addf %50, %52 : vector<2x8x8xf32>
    %cst_22 = arith.constant dense<0xFF800000> : vector<2x8xf32>
    %54 = vector.multi_reduction <maximumf>, %53, %cst_22 [2] : vector<2x8x8xf32> to vector<2x8xf32>
    %55 = vector.shape_cast %54 : vector<2x8xf32> to vector<2x8x1xf32>
    %56 = vector.broadcast %55 : vector<2x8x1xf32> to vector<2x8x8xf32>
    %57 = arith.subf %53, %56 : vector<2x8x8xf32>
    %58 = math.exp %57 : vector<2x8x8xf32>
    %cst_23 = arith.constant dense<0.000000e+00> : vector<2x8xf32>
    %59 = vector.multi_reduction <add>, %58, %cst_23 [2] : vector<2x8x8xf32> to vector<2x8xf32>
    %60 = vector.shape_cast %59 : vector<2x8xf32> to vector<2x8x1xf32>
    %61 = tpu.reciprocal %60 {approx = true} : vector<2x8x1xf32> -> vector<2x8x1xf32>
    %62 = vector.broadcast %61 : vector<2x8x1xf32> to vector<2x8x8xf32>
    %63 = arith.mulf %58, %62 : vector<2x8x8xf32>
    "tpu.trace_start"() <{level = 10 : i32, message = "bqk,bkd->bqd"}> : () -> ()
    %cst_24 = arith.constant dense<0.000000e+00> : vector<2x8x8xf32>
    %64 = tpu.matmul %63, %47, %cst_24 {dimension_numbers = #tpu.dot_dimension_numbers<[2], [1], [1], [2], [0, 0, 0, 1, 1, 2], [0], [0]>} : vector<2x8x8xf32>, vector<2x8x8xf32>, vector<2x8x8xf32> -> vector<2x8x8xf32>
    "tpu.trace_stop"() : () -> ()
    %65 = vector.shape_cast %64 : vector<2x8x8xf32> to vector<16x8xf32>
    %66 = vector.extract_strided_slice %13 {offsets = [8, 0], sizes = [8, 32], strides = [1, 1]} : vector<32x32xf32> to vector<8x32xf32>
    %cst_25 = arith.constant dense<0.000000e+00> : vector<16x32xf32>
    %67 = tpu.matmul %65, %66, %cst_25 {dimension_numbers = #tpu.dot_dimension_numbers<[1], [0], [0], [1], [0, 0, 1, 1], [], []>} : vector<16x8xf32>, vector<8x32xf32>, vector<16x32xf32> -> vector<16x32xf32>
    %68 = arith.addf %41, %67 : vector<16x32xf32>
    %69 = vector.extract_strided_slice %11 {offsets = [0, 16], sizes = [16, 8], strides = [1, 1]} : vector<16x96xf32> to vector<16x8xf32>
    %70 = vector.shape_cast %69 : vector<16x8xf32> to vector<2x8x8xf32>
    %71 = vector.extract_strided_slice %11 {offsets = [0, 48], sizes = [16, 8], strides = [1, 1]} : vector<16x96xf32> to vector<16x8xf32>
    %72 = vector.shape_cast %71 : vector<16x8xf32> to vector<2x8x8xf32>
    %73 = vector.extract_strided_slice %11 {offsets = [0, 80], sizes = [16, 8], strides = [1, 1]} : vector<16x96xf32> to vector<16x8xf32>
    %74 = vector.shape_cast %73 : vector<16x8xf32> to vector<2x8x8xf32>
    "tpu.trace_start"() <{level = 10 : i32, message = "bqd,bkd->bqk"}> : () -> ()
    %cst_26 = arith.constant dense<0.000000e+00> : vector<2x8x8xf32>
    %75 = tpu.matmul %70, %72, %cst_26 {dimension_numbers = #tpu.dot_dimension_numbers<[2], [2], [1], [1], [0, 0, 0, 1, 1, 1], [0], [0]>} : vector<2x8x8xf32>, vector<2x8x8xf32>, vector<2x8x8xf32> -> vector<2x8x8xf32>
    "tpu.trace_stop"() : () -> ()
    %cst_27 = arith.constant 0.353553385 : f32
    %76 = vector.broadcast %cst_27 : f32 to vector<2x8x8xf32>
    %77 = arith.mulf %75, %76 : vector<2x8x8xf32>
    %78 = vector.shape_cast %4 : vector<2x8xf32> to vector<2x1x8xf32>
    %79 = vector.broadcast %78 : vector<2x1x8xf32> to vector<2x8x8xf32>
    %80 = arith.addf %77, %79 : vector<2x8x8xf32>
    %cst_28 = arith.constant dense<0xFF800000> : vector<2x8xf32>
    %81 = vector.multi_reduction <maximumf>, %80, %cst_28 [2] : vector<2x8x8xf32> to vector<2x8xf32>
    %82 = vector.shape_cast %81 : vector<2x8xf32> to vector<2x8x1xf32>
    %83 = vector.broadcast %82 : vector<2x8x1xf32> to vector<2x8x8xf32>
    %84 = arith.subf %80, %83 : vector<2x8x8xf32>
    %85 = math.exp %84 : vector<2x8x8xf32>
    %cst_29 = arith.constant dense<0.000000e+00> : vector<2x8xf32>
    %86 = vector.multi_reduction <add>, %85, %cst_29 [2] : vector<2x8x8xf32> to vector<2x8xf32>
    %87 = vector.shape_cast %86 : vector<2x8xf32> to vector<2x8x1xf32>
    %88 = tpu.reciprocal %87 {approx = true} : vector<2x8x1xf32> -> vector<2x8x1xf32>
    %89 = vector.broadcast %88 : vector<2x8x1xf32> to vector<2x8x8xf32>
    %90 = arith.mulf %85, %89 : vector<2x8x8xf32>
    "tpu.trace_start"() <{level = 10 : i32, message = "bqk,bkd->bqd"}> : () -> ()
    %cst_30 = arith.constant dense<0.000000e+00> : vector<2x8x8xf32>
    %91 = tpu.matmul %90, %74, %cst_30 {dimension_numbers = #tpu.dot_dimension_numbers<[2], [1], [1], [2], [0, 0, 0, 1, 1, 2], [0], [0]>} : vector<2x8x8xf32>, vector<2x8x8xf32>, vector<2x8x8xf32> -> vector<2x8x8xf32>
    "tpu.trace_stop"() : () -> ()
    %92 = vector.shape_cast %91 : vector<2x8x8xf32> to vector<16x8xf32>
    %93 = vector.extract_strided_slice %13 {offsets = [16, 0], sizes = [8, 32], strides = [1, 1]} : vector<32x32xf32> to vector<8x32xf32>
    %cst_31 = arith.constant dense<0.000000e+00> : vector<16x32xf32>
    %94 = tpu.matmul %92, %93, %cst_31 {dimension_numbers = #tpu.dot_dimension_numbers<[1], [0], [0], [1], [0, 0, 1, 1], [], []>} : vector<16x8xf32>, vector<8x32xf32>, vector<16x32xf32> -> vector<16x32xf32>
    %95 = arith.addf %68, %94 : vector<16x32xf32>
    %96 = vector.extract_strided_slice %11 {offsets = [0, 24], sizes = [16, 8], strides = [1, 1]} : vector<16x96xf32> to vector<16x8xf32>
    %97 = vector.shape_cast %96 : vector<16x8xf32> to vector<2x8x8xf32>
    %98 = vector.extract_strided_slice %11 {offsets = [0, 56], sizes = [16, 8], strides = [1, 1]} : vector<16x96xf32> to vector<16x8xf32>
    %99 = vector.shape_cast %98 : vector<16x8xf32> to vector<2x8x8xf32>
    %100 = vector.extract_strided_slice %11 {offsets = [0, 88], sizes = [16, 8], strides = [1, 1]} : vector<16x96xf32> to vector<16x8xf32>
    %101 = vector.shape_cast %100 : vector<16x8xf32> to vector<2x8x8xf32>
    "tpu.trace_start"() <{level = 10 : i32, message = "bqd,bkd->bqk"}> : () -> ()
    %cst_32 = arith.constant dense<0.000000e+00> : vector<2x8x8xf32>
    %102 = tpu.matmul %97, %99, %cst_32 {dimension_numbers = #tpu.dot_dimension_numbers<[2], [2], [1], [1], [0, 0, 0, 1, 1, 1], [0], [0]>} : vector<2x8x8xf32>, vector<2x8x8xf32>, vector<2x8x8xf32> -> vector<2x8x8xf32>
    "tpu.trace_stop"() : () -> ()
    %cst_33 = arith.constant 0.353553385 : f32
    %103 = vector.broadcast %cst_33 : f32 to vector<2x8x8xf32>
    %104 = arith.mulf %102, %103 : vector<2x8x8xf32>
    %105 = vector.shape_cast %4 : vector<2x8xf32> to vector<2x1x8xf32>
    %106 = vector.broadcast %105 : vector<2x1x8xf32> to vector<2x8x8xf32>
    %107 = arith.addf %104, %106 : vector<2x8x8xf32>
    %cst_34 = arith.constant dense<0xFF800000> : vector<2x8xf32>
    %108 = vector.multi_reduction <maximumf>, %107, %cst_34 [2] : vector<2x8x8xf32> to vector<2x8xf32>
    %109 = vector.shape_cast %108 : vector<2x8xf32> to vector<2x8x1xf32>
    %110 = vector.broadcast %109 : vector<2x8x1xf32> to vector<2x8x8xf32>
    %111 = arith.subf %107, %110 : vector<2x8x8xf32>
    %112 = math.exp %111 : vector<2x8x8xf32>
    %cst_35 = arith.constant dense<0.000000e+00> : vector<2x8xf32>
    %113 = vector.multi_reduction <add>, %112, %cst_35 [2] : vector<2x8x8xf32> to vector<2x8xf32>
    %114 = vector.shape_cast %113 : vector<2x8xf32> to vector<2x8x1xf32>
    %115 = tpu.reciprocal %114 {approx = true} : vector<2x8x1xf32> -> vector<2x8x1xf32>
    %116 = vector.broadcast %115 : vector<2x8x1xf32> to vector<2x8x8xf32>
    %117 = arith.mulf %112, %116 : vector<2x8x8xf32>
    "tpu.trace_start"() <{level = 10 : i32, message = "bqk,bkd->bqd"}> : () -> ()
    %cst_36 = arith.constant dense<0.000000e+00> : vector<2x8x8xf32>
    %118 = tpu.matmul %117, %101, %cst_36 {dimension_numbers = #tpu.dot_dimension_numbers<[2], [1], [1], [2], [0, 0, 0, 1, 1, 2], [0], [0]>} : vector<2x8x8xf32>, vector<2x8x8xf32>, vector<2x8x8xf32> -> vector<2x8x8xf32>
    "tpu.trace_stop"() : () -> ()
    %119 = vector.shape_cast %118 : vector<2x8x8xf32> to vector<16x8xf32>
    %120 = vector.extract_strided_slice %13 {offsets = [24, 0], sizes = [8, 32], strides = [1, 1]} : vector<32x32xf32> to vector<8x32xf32>
    %cst_37 = arith.constant dense<0.000000e+00> : vector<16x32xf32>
    %121 = tpu.matmul %119, %120, %cst_37 {dimension_numbers = #tpu.dot_dimension_numbers<[1], [0], [0], [1], [0, 0, 1, 1], [], []>} : vector<16x8xf32>, vector<8x32xf32>, vector<16x32xf32> -> vector<16x32xf32>
    %122 = arith.addf %95, %121 : vector<16x32xf32>
    %c0_38 = arith.constant 0 : index
    %c0_39 = arith.constant 0 : index
    %c0_40 = arith.constant 0 : index
    %123 = vector.load %arg8[%c0_38, %c0_39, %c0_40] : memref<1x1x32xf32, #tpu.memory_space<vmem>>, vector<1x1x32xf32>
    %124 = vector.shape_cast %123 : vector<1x1x32xf32> to vector<1x32xf32>
    %125 = vector.broadcast %124 : vector<1x32xf32> to vector<16x32xf32>
    %126 = arith.addf %122, %125 : vector<16x32xf32>
    %127 = arith.addf %3, %126 : vector<16x32xf32>
    %c0_41 = arith.constant 0 : index
    %c0_42 = arith.constant 0 : index
    %c0_43 = arith.constant 0 : index
    %128 = vector.load %arg9[%c0_41, %c0_42, %c0_43] : memref<1x1x32xf32, #tpu.memory_space<vmem>>, vector<1x1x32xf32>
    %129 = vector.shape_cast %128 : vector<1x1x32xf32> to vector<1x32xf32>
    %c0_44 = arith.constant 0 : index
    %c0_45 = arith.constant 0 : index
    %c0_46 = arith.constant 0 : index
    %130 = vector.load %arg10[%c0_44, %c0_45, %c0_46] : memref<1x1x32xf32, #tpu.memory_space<vmem>>, vector<1x1x32xf32>
    %131 = vector.shape_cast %130 : vector<1x1x32xf32> to vector<1x32xf32>
    %cst_47 = arith.constant dense<0.000000e+00> : vector<16xf32>
    %132 = vector.multi_reduction <add>, %127, %cst_47 [1] : vector<16x32xf32> to vector<16xf32>
    %133 = vector.shape_cast %132 : vector<16xf32> to vector<16x1xf32>
    %cst_48 = arith.constant 3.200000e+01 : f32
    %134 = vector.broadcast %cst_48 : f32 to vector<16x1xf32>
    %135 = arith.divf %133, %134 : vector<16x1xf32>
    %136 = vector.broadcast %135 : vector<16x1xf32> to vector<16x32xf32>
    %137 = arith.subf %127, %136 : vector<16x32xf32>
    %138 = arith.mulf %137, %137 : vector<16x32xf32>
    %cst_49 = arith.constant dense<0.000000e+00> : vector<16xf32>
    %139 = vector.multi_reduction <add>, %138, %cst_49 [1] : vector<16x32xf32> to vector<16xf32>
    %140 = vector.shape_cast %139 : vector<16xf32> to vector<16x1xf32>
    %cst_50 = arith.constant 3.200000e+01 : f32
    %141 = vector.broadcast %cst_50 : f32 to vector<16x1xf32>
    %142 = arith.divf %140, %141 : vector<16x1xf32>
    %143 = vector.broadcast %135 : vector<16x1xf32> to vector<16x32xf32>
    %144 = arith.subf %127, %143 : vector<16x32xf32>
    %cst_51 = arith.constant 9.99999996E-13 : f32
    %145 = vector.broadcast %cst_51 : f32 to vector<16x1xf32>
    %146 = arith.addf %142, %145 : vector<16x1xf32>
    %147 = math.rsqrt %146 : vector<16x1xf32>
    %148 = vector.broadcast %147 : vector<16x1xf32> to vector<16x32xf32>
    %149 = arith.mulf %144, %148 : vector<16x32xf32>
    %150 = vector.broadcast %129 : vector<1x32xf32> to vector<16x32xf32>
    %151 = arith.mulf %149, %150 : vector<16x32xf32>
    %152 = vector.broadcast %131 : vector<1x32xf32> to vector<16x32xf32>
    %153 = arith.addf %151, %152 : vector<16x32xf32>
    %c0_52 = arith.constant 0 : index
    %c0_53 = arith.constant 0 : index
    %c0_54 = arith.constant 0 : index
    %154 = vector.load %arg11[%c0_52, %c0_53, %c0_54] : memref<1x32x64xf32, #tpu.memory_space<vmem>>, vector<1x32x64xf32>
    %155 = vector.shape_cast %154 : vector<1x32x64xf32> to vector<32x64xf32>
    %cst_55 = arith.constant dense<0.000000e+00> : vector<16x64xf32>
    %156 = tpu.matmul %153, %155, %cst_55 {dimension_numbers = #tpu.dot_dimension_numbers<[1], [0], [0], [1], [0, 0, 1, 1], [], []>} : vector<16x32xf32>, vector<32x64xf32>, vector<16x64xf32> -> vector<16x64xf32>
    %c0_56 = arith.constant 0 : index
    %c0_57 = arith.constant 0 : index
    %c0_58 = arith.constant 0 : index
    %157 = vector.load %arg12[%c0_56, %c0_57, %c0_58] : memref<1x1x64xf32, #tpu.memory_space<vmem>>, vector<1x1x64xf32>
    %158 = vector.shape_cast %157 : vector<1x1x64xf32> to vector<1x64xf32>
    %159 = vector.broadcast %158 : vector<1x64xf32> to vector<16x64xf32>
    %160 = arith.addf %156, %159 : vector<16x64xf32>
    %161 = arith.mulf %160, %160 : vector<16x64xf32>
    %162 = arith.mulf %160, %161 : vector<16x64xf32>
    %cst_59 = arith.constant 4.471500e-02 : f32
    %163 = vector.broadcast %cst_59 : f32 to vector<16x64xf32>
    %164 = arith.mulf %163, %162 : vector<16x64xf32>
    %165 = arith.addf %160, %164 : vector<16x64xf32>
    %cst_60 = arith.constant 0.797884583 : f32
    %166 = vector.broadcast %cst_60 : f32 to vector<16x64xf32>
    %167 = arith.mulf %166, %165 : vector<16x64xf32>
    %168 = math.tanh %167 : vector<16x64xf32>
    %cst_61 = arith.constant 1.000000e+00 : f32
    %169 = vector.broadcast %cst_61 : f32 to vector<16x64xf32>
    %170 = arith.addf %169, %168 : vector<16x64xf32>
    %cst_62 = arith.constant 5.000000e-01 : f32
    %171 = vector.broadcast %cst_62 : f32 to vector<16x64xf32>
    %172 = arith.mulf %171, %170 : vector<16x64xf32>
    %173 = arith.mulf %160, %172 : vector<16x64xf32>
    %c0_63 = arith.constant 0 : index
    %c0_64 = arith.constant 0 : index
    %c0_65 = arith.constant 0 : index
    %174 = vector.load %arg13[%c0_63, %c0_64, %c0_65] : memref<1x64x32xf32, #tpu.memory_space<vmem>>, vector<1x64x32xf32>
    %175 = vector.shape_cast %174 : vector<1x64x32xf32> to vector<64x32xf32>
    %cst_66 = arith.constant dense<0.000000e+00> : vector<16x32xf32>
    %176 = tpu.matmul %173, %175, %cst_66 {dimension_numbers = #tpu.dot_dimension_numbers<[1], [0], [0], [1], [0, 0, 1, 1], [], []>} : vector<16x64xf32>, vector<64x32xf32>, vector<16x32xf32> -> vector<16x32xf32>
    %c0_67 = arith.constant 0 : index
    %c0_68 = arith.constant 0 : index
    %c0_69 = arith.constant 0 : index
    %177 = vector.load %arg14[%c0_67, %c0_68, %c0_69] : memref<1x1x32xf32, #tpu.memory_space<vmem>>, vector<1x1x32xf32>
    %178 = vector.shape_cast %177 : vector<1x1x32xf32> to vector<1x32xf32>
    %179 = vector.broadcast %178 : vector<1x32xf32> to vector<16x32xf32>
    %180 = arith.addf %176, %179 : vector<16x32xf32>
    %181 = arith.addf %153, %180 : vector<16x32xf32>
    %c0_70 = arith.constant 0 : index
    %c0_71 = arith.constant 0 : index
    %c0_72 = arith.constant 0 : index
    %182 = vector.load %arg15[%c0_70, %c0_71, %c0_72] : memref<1x1x32xf32, #tpu.memory_space<vmem>>, vector<1x1x32xf32>
    %183 = vector.shape_cast %182 : vector<1x1x32xf32> to vector<1x32xf32>
    %c0_73 = arith.constant 0 : index
    %c0_74 = arith.constant 0 : index
    %c0_75 = arith.constant 0 : index
    %184 = vector.load %arg16[%c0_73, %c0_74, %c0_75] : memref<1x1x32xf32, #tpu.memory_space<vmem>>, vector<1x1x32xf32>
    %185 = vector.shape_cast %184 : vector<1x1x32xf32> to vector<1x32xf32>
    %cst_76 = arith.constant dense<0.000000e+00> : vector<16xf32>
    %186 = vector.multi_reduction <add>, %181, %cst_76 [1] : vector<16x32xf32> to vector<16xf32>
    %187 = vector.shape_cast %186 : vector<16xf32> to vector<16x1xf32>
    %cst_77 = arith.constant 3.200000e+01 : f32
    %188 = vector.broadcast %cst_77 : f32 to vector<16x1xf32>
    %189 = arith.divf %187, %188 : vector<16x1xf32>
    %190 = vector.broadcast %189 : vector<16x1xf32> to vector<16x32xf32>
    %191 = arith.subf %181, %190 : vector<16x32xf32>
    %192 = arith.mulf %191, %191 : vector<16x32xf32>
    %cst_78 = arith.constant dense<0.000000e+00> : vector<16xf32>
    %193 = vector.multi_reduction <add>, %192, %cst_78 [1] : vector<16x32xf32> to vector<16xf32>
    %194 = vector.shape_cast %193 : vector<16xf32> to vector<16x1xf32>
    %cst_79 = arith.constant 3.200000e+01 : f32
    %195 = vector.broadcast %cst_79 : f32 to vector<16x1xf32>
    %196 = arith.divf %194, %195 : vector<16x1xf32>
    %197 = vector.broadcast %189 : vector<16x1xf32> to vector<16x32xf32>
    %198 = arith.subf %181, %197 : vector<16x32xf32>
    %cst_80 = arith.constant 9.99999996E-13 : f32
    %199 = vector.broadcast %cst_80 : f32 to vector<16x1xf32>
    %200 = arith.addf %196, %199 : vector<16x1xf32>
    %201 = math.rsqrt %200 : vector<16x1xf32>
    %202 = vector.broadcast %201 : vector<16x1xf32> to vector<16x32xf32>
    %203 = arith.mulf %198, %202 : vector<16x32xf32>
    %204 = vector.broadcast %183 : vector<1x32xf32> to vector<16x32xf32>
    %205 = arith.mulf %203, %204 : vector<16x32xf32>
    %206 = vector.broadcast %185 : vector<1x32xf32> to vector<16x32xf32>
    %207 = arith.addf %205, %206 : vector<16x32xf32>
    %c0_81 = arith.constant 0 : index
    %c0_82 = arith.constant 0 : index
    %208 = vector.load %arg20[%c0_81, %c0_82] : memref<16x32xf32, #tpu.memory_space<vmem>>, vector<16x32xf32>
    tpu.vector_store %arg20[%c0_81, %c0_82], %207 {strides = array<i32>} : memref<16x32xf32, #tpu.memory_space<vmem>>, vector<16x32xf32>,
    %c1_i32 = arith.constant 1 : i32
    %209 = arith.cmpi eq, %arg0, %c1_i32 : i32
    %210 = arith.extui %209 : i1 to i32
    %c0_i32_83 = arith.constant 0 : i32
    %211 = arith.cmpi ne, %210, %c0_i32_83 : i32
    scf.if %211 {
      %212 = vector.extract_strided_slice %207 {offsets = [0, 0], sizes = [1, 32], strides = [1, 1]} : vector<16x32xf32> to vector<1x32xf32>
      %213 = vector.extract_strided_slice %207 {offsets = [8, 0], sizes = [1, 32], strides = [1, 1]} : vector<16x32xf32> to vector<1x32xf32>
      %214 = tpu.concatenate %212, %213 in 0 : vector<1x32xf32>, vector<1x32xf32> -> vector<2x32xf32>
      %c0_84 = arith.constant 0 : index
      %c0_85 = arith.constant 0 : index
      %215 = vector.load %arg17[%c0_84, %c0_85] : memref<32x1xf32, #tpu.memory_space<vmem>>, vector<32x1xf32>
      %cst_86 = arith.constant dense<0.000000e+00> : vector<2x1xf32>
      %216 = tpu.matmul %214, %215, %cst_86 {dimension_numbers = #tpu.dot_dimension_numbers<[1], [0], [0], [1], [0, 0, 1, 1], [], []>} : vector<2x32xf32>, vector<32x1xf32>, vector<2x1xf32> -> vector<2x1xf32>
      %c0_87 = arith.constant 0 : index
      %c0_88 = arith.constant 0 : index
      %217 = vector.load %arg18[%c0_87, %c0_88] : memref<1x1xf32, #tpu.memory_space<vmem>>, vector<1x1xf32>
      %218 = vector.broadcast %217 : vector<1x1xf32> to vector<2x1xf32>
      %219 = arith.addf %216, %218 : vector<2x1xf32>
      %220 = arith.negf %219 : vector<2x1xf32>
      %221 = math.exp %220 : vector<2x1xf32>
      %cst_89 = arith.constant 1.000000e+00 : f32
      %222 = vector.broadcast %cst_89 : f32 to vector<2x1xf32>
      %223 = arith.addf %222, %221 : vector<2x1xf32>
      %224 = arith.divf %222, %223 : vector<2x1xf32>
      %c0_90 = arith.constant 0 : index
      %c0_91 = arith.constant 0 : index
      %225 = vector.load %arg19[%c0_90, %c0_91] : memref<2x1xf32, #tpu.memory_space<vmem>>, vector<2x1xf32>
      tpu.vector_store %arg19[%c0_90, %c0_91], %224 {strides = array<i32>} : memref<2x1xf32, #tpu.memory_space<vmem>>, vector<2x1xf32>,
    } else {
    }
    return
  }
  func.func @transform_0(%arg0: i32) -> (i32, i32) {
    %c0_i32 = arith.constant 0 : i32
    %c0_i32_0 = arith.constant 0 : i32
    %c0_i32_1 = arith.constant 0 : i32
    return %c0_i32, %c0_i32_0 : i32, i32
  }
  func.func @transform_1(%arg0: i32) -> (i32, i32) {
    %c0_i32 = arith.constant 0 : i32
    %c0_i32_0 = arith.constant 0 : i32
    %c0_i32_1 = arith.constant 0 : i32
    return %c0_i32, %c0_i32_0 : i32, i32
  }
  func.func @transform_2(%arg0: i32) -> (i32, i32) {
    %c0_i32 = arith.constant 0 : i32
    %c0_i32_0 = arith.constant 0 : i32
    %c0_i32_1 = arith.constant 0 : i32
    return %c0_i32, %c0_i32_0 : i32, i32
  }
  func.func @transform_3(%arg0: i32) -> (i32, i32) {
    %c0_i32 = arith.constant 0 : i32
    %c0_i32_0 = arith.constant 0 : i32
    %c0_i32_1 = arith.constant 0 : i32
    return %c0_i32, %c0_i32_0 : i32, i32
  }
  func.func @transform_4(%arg0: i32) -> (i32, i32, i32) {
    %c0_i32 = arith.constant 0 : i32
    %c0_i32_0 = arith.constant 0 : i32
    %c0_i32_1 = arith.constant 0 : i32
    return %arg0, %c0_i32, %c0_i32_0 : i32, i32, i32
  }
  func.func @transform_5(%arg0: i32) -> (i32, i32, i32) {
    %c0_i32 = arith.constant 0 : i32
    %c0_i32_0 = arith.constant 0 : i32
    %c0_i32_1 = arith.constant 0 : i32
    return %arg0, %c0_i32, %c0_i32_0 : i32, i32, i32
  }
  func.func @transform_6(%arg0: i32) -> (i32, i32, i32) {
    %c0_i32 = arith.constant 0 : i32
    %c0_i32_0 = arith.constant 0 : i32
    %c0_i32_1 = arith.constant 0 : i32
    return %arg0, %c0_i32, %c0_i32_0 : i32, i32, i32
  }
  func.func @transform_7(%arg0: i32) -> (i32, i32, i32) {
    %c0_i32 = arith.constant 0 : i32
    %c0_i32_0 = arith.constant 0 : i32
    %c0_i32_1 = arith.constant 0 : i32
    return %arg0, %c0_i32, %c0_i32_0 : i32, i32, i32
  }
  func.func @transform_8(%arg0: i32) -> (i32, i32, i32) {
    %c0_i32 = arith.constant 0 : i32
    %c0_i32_0 = arith.constant 0 : i32
    %c0_i32_1 = arith.constant 0 : i32
    return %arg0, %c0_i32, %c0_i32_0 : i32, i32, i32
  }
  func.func @transform_9(%arg0: i32) -> (i32, i32, i32) {
    %c0_i32 = arith.constant 0 : i32
    %c0_i32_0 = arith.constant 0 : i32
    %c0_i32_1 = arith.constant 0 : i32
    return %arg0, %c0_i32, %c0_i32_0 : i32, i32, i32
  }
  func.func @transform_10(%arg0: i32) -> (i32, i32, i32) {
    %c0_i32 = arith.constant 0 : i32
    %c0_i32_0 = arith.constant 0 : i32
    %c0_i32_1 = arith.constant 0 : i32
    return %arg0, %c0_i32, %c0_i32_0 : i32, i32, i32
  }
  func.func @transform_11(%arg0: i32) -> (i32, i32, i32) {
    %c0_i32 = arith.constant 0 : i32
    %c0_i32_0 = arith.constant 0 : i32
    %c0_i32_1 = arith.constant 0 : i32
    return %arg0, %c0_i32, %c0_i32_0 : i32, i32, i32
  }
  func.func @transform_12(%arg0: i32) -> (i32, i32, i32) {
    %c0_i32 = arith.constant 0 : i32
    %c0_i32_0 = arith.constant 0 : i32
    %c0_i32_1 = arith.constant 0 : i32
    return %arg0, %c0_i32, %c0_i32_0 : i32, i32, i32
  }
  func.func @transform_13(%arg0: i32) -> (i32, i32, i32) {
    %c0_i32 = arith.constant 0 : i32
    %c0_i32_0 = arith.constant 0 : i32
    %c0_i32_1 = arith.constant 0 : i32
    return %arg0, %c0_i32, %c0_i32_0 : i32, i32, i32
  }
  func.func @transform_14(%arg0: i32) -> (i32, i32, i32) {
    %c0_i32 = arith.constant 0 : i32
    %c0_i32_0 = arith.constant 0 : i32
    %c0_i32_1 = arith.constant 0 : i32
    return %arg0, %c0_i32, %c0_i32_0 : i32, i32, i32
  }
  func.func @transform_15(%arg0: i32) -> (i32, i32, i32) {
    %c0_i32 = arith.constant 0 : i32
    %c0_i32_0 = arith.constant 0 : i32
    %c0_i32_1 = arith.constant 0 : i32
    return %arg0, %c0_i32, %c0_i32_0 : i32, i32, i32
  }
  func.func @transform_16(%arg0: i32) -> (i32, i32) {
    %c0_i32 = arith.constant 0 : i32
    %c0_i32_0 = arith.constant 0 : i32
    %c0_i32_1 = arith.constant 0 : i32
    return %c0_i32, %c0_i32_0 : i32, i32
  }
  func.func @transform_17(%arg0: i32) -> (i32, i32) {
    %c0_i32 = arith.constant 0 : i32
    %c0_i32_0 = arith.constant 0 : i32
    %c0_i32_1 = arith.constant 0 : i32
    return %c0_i32, %c0_i32_0 : i32, i32
  }
  func.func @transform_18(%arg0: i32) -> (i32, i32) {
    %c0_i32 = arith.constant 0 : i32
    %c0_i32_0 = arith.constant 0 : i32
    %c0_i32_1 = arith.constant 0 : i32
    return %c0_i32, %c0_i32_0 : i32, i32
  }
}

</mosaic_0001>

<bundles_post_ra>
// kernel: custom_distilbert_forward.1
= control target key start
LH: loop header
LB: loop body
LE: loop exit
PB: predicated region body
PF: predicated region fallthrough
CT: control target
= control target key end

     0   :  { %s2205_s29 = smov 0   ;;  %s2511_s0 = inlined_call_operand.vmem [shape: f32[16,32], index: 0, kind: input, shape index: {}]   ;;  %s2512_s1 = inlined_call_operand.vmem [shape: f32[2,8], index: 1, kind: input, shape index: {}]   ;;  %s2513_s2 = inlined_call_operand.vmem [shape: f32[1,32], index: 2, kind: input, shape index: {}]   ;;  %s2514_s3 = inlined_call_operand.vmem [shape: f32[1,32], index: 3, kind: input, shape index: {}]   ;;  %s2515_s4 = inlined_call_operand.vmem [shape: f32[2,32,96], index: 4, kind: input, shape index: {}]   ;;  %s2516_s5 = inlined_call_operand.vmem [shape: f32[2,1,96], index: 5, kind: input, shape index: {}]   ;;  %s2517_s6 = inlined_call_operand.vmem [shape: f32[2,32,32], index: 6, kind: input, shape index: {}]   ;;  %s2518_s7 = inlined_call_operand.vmem [shape: f32[2,1,32], index: 7, kind: input, shape index: {}]   ;;  %s2519_s8 = inlined_call_operand.vmem [shape: f32[2,1,32], index: 8, kind: input, shape index: {}]   ;;  %s2520_s9 = inlined_call_operand.vmem [shape: f32[2,1,32], index: 9, kind: input, shape index: {}]   ;;  %s2521_s10 = inlined_call_operand.vmem [shape: f32[2,32,64], index: 10, kind: input, shape index: {}]   ;;  %s2522_s11 = inlined_call_operand.vmem [shape: f32[2,1,64], index: 11, kind: input, shape index: {}]   ;;  %s2523_s12 = inlined_call_operand.vmem [shape: f32[2,64,32], index: 12, kind: input, shape index: {}]   ;;  %s2524_s13 = inlined_call_operand.vmem [shape: f32[2,1,32], index: 13, kind: input, shape index: {}]   ;;  %s2525_s14 = inlined_call_operand.vmem [shape: f32[2,1,32], index: 14, kind: input, shape index: {}]   ;;  %s2526_s15 = inlined_call_operand.vmem [shape: f32[2,1,32], index: 15, kind: input, shape index: {}]   ;;  %s2527_s16 = inlined_call_operand.vmem [shape: f32[32,1], index: 16, kind: input, shape index: {}]   ;;  %s2528_s17 = inlined_call_operand.<no memory space> [shape: f32[1,1], index: 17, kind: input, shape index: {}]   ;;  %s2529_s18 = inlined_call_operand.vmem [shape: f32[2,1], index: 18, kind: output, shape index: {}]  }
   0x1   :  { %2534 = sst [smem:[#allocation6_spill]] %s2511_s0  ;;  %v23_v0 = vstv %s2528_s17 }
   0x2   :  { %2535 = sst [smem:[#allocation7_spill]] %s2512_s1  ;;  %24 = vst [vmem:[#allocation3] sm:$0x1] %v23_v0 }
   0x3   :  { %2536 = sst [smem:[#allocation8_spill]] %s2513_s2 }
   0x4   :  { %2537 = sst [smem:[#allocation9_spill]] %s2515_s4 }
   0x5   :  { %2538 = sst [smem:[#allocation10_spill]] %s2517_s6 }
   0x6   :  { %2539 = sst [smem:[#allocation11_spill]] %s2527_s16 }
   0x7   :  { %2540 = sst [smem:[#allocation12_spill]] %s2529_s18 }
   0x8 LB: > { %2541 = sst [smem:[#allocation4_spill]] %s2092_s29  ;;  %s2211_s30 = sadd.s32 4294967295, %s2092_s29   ;;  %s2092_s29 = sphi %s2205_s29, %s30_s29  }
   0x9   : > { %p1941_p0 = scmp.ge.s32.totalorder %s2092_s29, 1  ;;  %p603_p1 = scmp.lt.s32.totalorder %s2092_s29, 3 }
   0xb   : > { %p604_p2 = pnand %p1941_p0, %p603_p1 }
   0xd   : > { %607 = sbr.rel (%p604_p2) target bundleno = 3034 (0xbda), region = 92 }
  0x12   : > { %p691_p3 = scmp.lt.s32.totalorder %s2211_s30, 1  ;;  %s2542_s4 = sld [smem:[#allocation9_spill]] }
  0x13   : > { %s2543_s6 = sld [smem:[#allocation10_spill]]  ;;  %p1950_p4 = scmp.ne.s32.totalorder %s2211_s30, 0 }
  0x14   : > { %s2217_s17 = scalar_select %p691_p3, %s2211_s30, 1 }
  0x15   : > { %s2545_s26 = sld [smem:[#allocation6_spill]] (!%p1950_p4) }
  0x16   : > { %s1994_s0 = sshll.u32 %s2217_s17, 5  ;;  %s728_s19 = scalar_lea.vmem %s2524_s13, %s2217_s17 }
  0x17   : > { %s731_s21 = scalar_lea.vmem %s2525_s14, %s2217_s17  ;;  %s734_s16 = scalar_lea.vmem %s2526_s15, %s2217_s17 }
  0x18   : > { %s2227_s2 = scalar_lea.vmem %s2542_s4, %s1994_s0  ;;  %s2249_s4 = scalar_lea.vmem %s2521_s10, %s1994_s0 }
  0x19   : > { %s2232_s25 = scalar_lea.vmem %s2543_s6, %s1994_s0  ;;  %s720_s6 = scalar_lea.vmem %s2522_s11, %s2217_s17 }
  0x1a   : > { %2544 = sst [smem:[#allocation5_spill]] %s2232_s25  ;;  %s1997_s25 = sshll.u32 %s2217_s17, 6 }
  0x1b   : > { %s2259_s28 = scalar_lea.vmem %s2523_s12, %s1997_s25  ;;  %738 = sbr.rel (%p1950_p4) target bundleno = 310 (0x136), region = 96 }
  0x1c   : > { %s2546_s29 = sld [smem:[#allocation8_spill]] (!%p1950_p4) }
  0x20   : > { %v739_v1 = vld [vmem:[%s2545_s26] sm:$0xff]  ;;  %vm743_vm0 = vcmask 261120   ;;  %v740_v3 = vld [vmem:[%s2545_s26 + $0x8] sm:$0xff]  ;;  %v2094_v5 = vmov 32.0  }
  0x21   : > { %v744_v2 = vsel %vm743_vm0, %v739_v1, 0.0  ;;  %v747_v4 = vsel %vm743_vm0, %v740_v3, 0.0  ;;  %2021 = vrcp.f32 %v2094_v5  ;;  %v2020_v39 = vld [vmem:[%s2514_s3] ss:$0 sm:$0xff] }
  0x22   : > { %745 = vadd.xlane.f32.xlu0 %v744_v2  ;;  %v2019_v36 = vld [vmem:[%s2546_s29] ss:$0 sm:$0xff] }
  0x27   : > { %v2022_v6 = vpop.eup %2021 }
  0x28   : > { %v751_v7 = vmul.f32 32.0, %v2022_v6  ;;  %vm755_vm1 = vweird.f32 %v2022_v6 }
  0x2a   : > { %748 = vadd.xlane.f32.xlu0 %v747_v4  ;;  %v752_v8 = vsub.f32 1.0, %v751_v7 }
  0x2c   : > { %v753_v9 = vmul.f32 %v2022_v6, %v752_v8 }
  0x2e   : > { %v754_v10 = vadd.f32 %v2022_v6, %v753_v9 }
  0x30   : > { %v756_v11 = vsel %vm755_vm1, %v2022_v6, %v754_v10 }
  0x95   : > { %v746_v12 = vpop.xlane.xlu0 %745 }
  0x96   : > { %v757_v13 = vmul.f32 %v756_v11, %v746_v12 }
  0x98   : > { %v759_v14 = vsub.f32 %v739_v1, %v757_v13 }
  0x9a   : > { %v761_v15 = vmul.f32 %v759_v14, %v759_v14 }
  0x9c   : > { %v763_v16 = vsel %vm743_vm0, %v761_v15, 0.0 }
  0x9d   : > { %764 = vadd.xlane.f32.xlu1 %v763_v16  ;;  %v749_v17 = vpop.xlane.xlu0 %748 }
  0x9e   : > { %v758_v18 = vmul.f32 %v756_v11, %v749_v17 }
  0xa0   : > { %v760_v19 = vsub.f32 %v740_v3, %v758_v18 }
  0xa2   : > { %v762_v20 = vmul.f32 %v760_v19, %v760_v19 }
  0xa4   : > { %v766_v21 = vsel %vm743_vm0, %v762_v20, 0.0 }
  0xa5   : > { %767 = vadd.xlane.f32.xlu1 %v766_v21 }
 0x110   : > { %v765_v22 = vpop.xlane.xlu1 %764 }
 0x111   : > { %v769_v23 = vmul.f32 %v765_v22, %v756_v11 }
 0x113   : > { %v771_v24 = vadd.f32 1e-12, %v769_v23 }
 0x115   : > { %2023 = vrsqrt.f32 %v771_v24  ;;  %vm779_vm3 = vweird.f32 %v771_v24 }
 0x118   : > { %v768_v25 = vpop.xlane.xlu1 %767 }
 0x119   : > { %v770_v26 = vmul.f32 %v768_v25, %v756_v11 }
 0x11b   : > { %v2024_v27 = vpop.eup %2023  ;;  %v772_v28 = vadd.f32 1e-12, %v770_v26 }
 0x11c   : > { %v774_v29 = vmul.f32 %v2024_v27, %v771_v24  ;;  %vm780_vm2 = vweird.f32 %v2024_v27 }
 0x11d   : > { %2025 = vrsqrt.f32 %v772_v28  ;;  %vm781_vm4 = vmor %vm779_vm3, %vm780_vm2  ;;  %vm789_vm6 = vweird.f32 %v772_v28 }
 0x11e   : > { %v775_v30 = vmul.f32 %v2024_v27, %v774_v29 }
 0x120   : > { %v776_v31 = vmul.f32 0.5, %v775_v30 }
 0x122   : > { %v777_v32 = vsub.f32 1.5, %v776_v31 }
 0x123   : > { %v2026_v33 = vpop.eup %2025 }
 0x124   : > { %v778_v34 = vmul.f32 %v2024_v27, %v777_v32  ;;  %v784_v35 = vmul.f32 %v2026_v33, %v772_v28  ;;  %vm790_vm5 = vweird.f32 %v2026_v33 }
 0x125   : > { %vm791_vm7 = vmor %vm789_vm6, %vm790_vm5 }
 0x126   : > { %v782_v37 = vsel %vm781_vm4, %v2024_v27, %v778_v34  ;;  %v785_v38 = vmul.f32 %v2026_v33, %v784_v35 }
 0x127   : > { %v793_v40 = vmul.f32 %v782_v37, %v759_v14 }
 0x128   : > { %v786_v41 = vmul.f32 0.5, %v785_v38 }
 0x129   : > { %v798_v42 = vmul.f32 %v2019_v36, %v793_v40 }
 0x12a   : > { %v787_v43 = vsub.f32 1.5, %v786_v41 }
 0x12b   : > { %v803_v44 = vadd.f32 %v2020_v39, %v798_v42 }
 0x12c   : > { %v788_v45 = vmul.f32 %v2026_v33, %v787_v43 }
 0x12d   : > { %805 = vst.msk [vmem:[#allocation2] sm:$0xff] %vm743_vm0, %v803_v44 }
 0x12e   : > { %v792_v46 = vsel %vm791_vm7, %v2026_v33, %v788_v45 }
 0x12f   : > { %v794_v47 = vmul.f32 %v792_v46, %v760_v19 }
 0x131   : > { %v799_v48 = vmul.f32 %v2019_v36, %v794_v47 }
 0x133   : > { %v804_v49 = vadd.f32 %v2020_v39, %v799_v48 }
 0x135   : > { %806 = vst.msk [vmem:[#allocation2 + $0x8] sm:$0xff] %vm743_vm0, %v804_v49 }
 0x136 PF: > { %v813_v50 = vld [vmem:[%s2227_s2 + $0x18] sm:$0xff]  ;;  %v812_v51 = vld [vmem:[%s2227_s2 + $0x10] sm:$0xff]  ;;  %v811_v52 = vld [vmem:[%s2227_s2 + $0x8] sm:$0xff]  ;;  %vm818_vm8 = vcmask 261120   ;;  %s2547_s24 = scalar_lea.vmem %s2516_s5, %s2217_s17  ;;  %s2096_s25 = smov 96   ;;  %vm855_vm9 = vcmask 64512  }
 0x137   : > { %837 = vmatpush.msra.mxu0 %v813_v50  ;;  %v810_v53 = vld [vmem:[%s2227_s2] sm:$0xff]  ;;  %s2095_s2 = smov 88   ;;  %s2097_s27 = smov 120   ;;  %vm1651_vm1 = vcmask 523264  }
 0x138   : > { %v2296_v54 = vld [vmem:[#allocation2] sm:$0xff]  ;;  %s2548_s29 = sld [smem:[#allocation7_spill]]  ;;  %s2098_s1 = smov 64  }
 0x139   : > { %838 = vmatpush.msra.mxu0 %v812_v51  ;;  %v2027_v56 = vld [vmem:[%s2547_s24] ss:$0 sm:$0xff]  ;;  %s2099_s0 = smov 80   ;;  %s2100_s22 = smov 56  }
 0x13a   : > { %s2101_s23 = smov 112   ;;  %s2549_s24 = sld [smem:[#allocation5_spill]] }
 0x13b   : > { %839 = vmatpush.msra.mxu0 %v811_v52  ;;  %s2105_s20 = smov 40   ;;  %p1989_p5 = scmp.ne.s32.totalorder %s2211_s30, 1 }
 0x13c   : > { %v2300_v55 = vld [vmem:[#allocation2 + $0x8] sm:$0xff] }
 0x13d   : > { %840 = vmatpush.msra.mxu0 %v810_v53 }
 0x13e   : > { %1951 = vmatmul.msk.f32.vlgmr.msra.gmra.mxu0 %vm818_vm8, %v2296_v54  ;;  %v809_v2 = vld [vmem:[%s2548_s29] sm:$0x3] }
 0x13f   : > { %v2331_v3 = vperm.slane %v809_v2, 0  ;;  %v910_v11 = vrot.slane %v809_v2, 1 }
 0x140   : > { %v848_v52 = vld [vmem:[%s2549_s24] sm:$0xff]  ;;  %v849_v53 = vld [vmem:[%s2549_s24 + $0x8] sm:$0xff] }
 0x141   : > { %v2337_v13 = vperm.slane %v910_v11, 0 }
 0x146   : > { %1952 = vmatmul.msk.f32.gmra.mxu0 %vm818_vm8, %v2300_v55 }
 0x1bb   : > { %v842_v57 = vpop.f32.mrf.mxu0 }
 0x1bc   : > { %v2309_v58 = vadd.f32 %v2027_v56, %v842_v57 }
 0x1be   : > { %993 = vrot.lane.b32.xlu1 %v2309_v58, %s2095_s2  ;;  %853 = vrot.lane.b32.xlu0 %v2309_v58, %s2096_s25 }
 0x1c3   : > { %v845_v59 = vpop.f32.mrf.mxu0 }
 0x1c4   : > { %v2313_v60 = vadd.f32 %v2027_v56, %v845_v59 }
 0x1c6   : > { %991 = vrot.lane.b32.xlu1 %v2309_v58, %s2097_s27  ;;  %881 = vrot.lane.b32.xlu0 %v2313_v60, %s2096_s25  ;;  %s2103_s25 = smov 72  }
 0x1ce   : > { %1021 = vrot.lane.b32.xlu1 %v2313_v60, %s2095_s2  ;;  %s2102_s2 = smov 48  }
 0x230   : > { %v994_v61 = vpop.permute.xlu1 %993  ;;  %v854_v62 = vpop.permute.xlu0 %853 }
 0x231   : > { %1953 = vmatpush.xpose.msk.msrb.mxu0 %vm855_vm9, %v854_v62  ;;  %1959 = vmatpush.xpose.msk.msra.mxu1 %vm855_vm9, %v994_v61 }
 0x234   : > { %1954 = vmatmul.msk.f32.vlgmr.msrb.gmra.mxu0 %vm855_vm9, %v2309_v58 }
 0x235   : > { %1175 = vmatpush.msra.mxu0 %v848_v52 }
 0x238   : > { %v992_v63 = vpop.permute.xlu1 %991  ;;  %v882_v0 = vpop.permute.xlu0 %881 }
 0x239   : > { %1955 = vmatpush.xpose.msk.msra.mxu2 %vm855_vm9, %v882_v0  ;;  %1960 = vmatmul.msk.f32.vlgmr.msra.gmra.mxu1 %vm855_vm9, %v992_v63 }
 0x23c   : > { %1956 = vmatmul.msk.f32.vlgmr.msra.gmra.mxu2 %vm855_vm9, %v2313_v60 }
 0x240   : > { %v1022_v1 = vpop.permute.xlu1 %1021 }
 0x241   : > { %1961 = vmatpush.xpose.msk.msrb.mxu2 %vm855_vm9, %v1022_v1 }
 0x245   : > { %1146 = vmatpush.msra.mxu2 %v849_v53 }
 0x2b1   : > { %v877_v4 = vpop.f32.mrf.mxu0 }
 0x2b2   : > { %v907_v5 = vmul.f32 0.35355338, %v877_v4 }
 0x2b4   : > { %v915_v6 = vadd.f32 %v2331_v3, %v907_v5 }
 0x2b6   : > { %v1016_v7 = vpop.f32.mrf.mxu1  ;;  %v917_v8 = vsel %vm855_vm9, %v915_v6, -inf }
 0x2b7   : > { %v1047_v9 = vmul.f32 0.35355338, %v1016_v7  ;;  %918 = vmax.xlane.f32.xlu2 %v917_v8 }
 0x2b9   : > { %v1049_v10 = vadd.f32 %v1047_v9, %v2331_v3 }
 0x2bb   : > { %v1051_v12 = vsel %vm855_vm9, %v1049_v10, -inf }
 0x2bc   : > { %1052 = vmax.xlane.f32.xlu0 %v1051_v12 }
 0x2bf   : > { %v904_v14 = vpop.f32.mrf.mxu2 }
 0x2c0   : > { %v908_v15 = vmul.f32 0.35355338, %v904_v14 }
 0x2c2   : > { %v916_v16 = vadd.f32 %v2337_v13, %v908_v15 }
 0x2c4   : > { %v920_v17 = vsel %vm855_vm9, %v916_v16, -inf }
 0x2c5   : > { %921 = vmax.xlane.f32.xlu2 %v920_v17 }
 0x2d0   : > { %965 = vrot.lane.b32.xlu0 %v2313_v60, %s2098_s1 }
 0x2d8   : > { %1019 = vrot.lane.b32.xlu0 %v2313_v60, %s2097_s27  ;;  %s2104_s27 = smov 104  }
 0x2dd   : > { %939 = vrot.lane.b32.xlu2 %v2309_v58, %s2098_s1  ;;  %s2550_s1 = scalar_lea.vmem %s2518_s7, %s2217_s17 }
 0x2e0   : > { %1185 = vrot.lane.b32.xlu0 %v2309_v58, %s2099_s0 }
 0x2e8   : > { %1213 = vrot.lane.b32.xlu0 %v2313_v60, %s2099_s0 }
 0x32a   : > { %v919_v18 = vpop.xlane.xlu2 %918 }
 0x32b   : > { %v923_v19 = vsub.f32 %v915_v6, %v919_v18 }
 0x32d   : > { %v925_v20 = vmul.f32 1.442695, %v923_v19 }
 0x32f   : > { %2035 = vpow2.f32 %v925_v20  ;;  %v1053_v21 = vpop.xlane.xlu0 %1052 }
 0x330   : > { %v1057_v22 = vsub.f32 %v1049_v10, %v1053_v21 }
 0x332   : > { %v1059_v23 = vmul.f32 1.442695, %v1057_v22 }
 0x334   : > { %2037 = vpow2.f32 %v1059_v23 }
 0x335   : > { %v2036_v24 = vpop.eup %2035 }
 0x336   : > { %v929_v25 = vsel %vm855_vm9, %v2036_v24, 0.0 }
 0x337   : > { %930 = vadd.xlane.f32.xlu1 %v929_v25 }
 0x338   : > { %v922_v26 = vpop.xlane.xlu2 %921 }
 0x339   : > { %v924_v27 = vsub.f32 %v916_v16, %v922_v26 }
 0x33a   : > { %v2038_v28 = vpop.eup %2037 }
 0x33b   : > { %v927_v29 = vmul.f32 1.442695, %v924_v27  ;;  %v1063_v30 = vsel %vm855_vm9, %v2038_v28, 0.0 }
 0x33c   : > { %1064 = vadd.xlane.f32.xlu2 %v1063_v30 }
 0x33d   : > { %2039 = vpow2.f32 %v927_v29 }
 0x340   : > { %v940_v31 = vpop.permute.xlu2 %939 }
 0x341   : > { %960 = vmatpush.msra.mxu3 %v940_v31 }
 0x342   : > { %v966_v32 = vpop.permute.xlu0 %965 }
 0x343   : > { %v2040_v33 = vpop.eup %2039  ;;  %986 = vmatpush.msrb.mxu3 %v966_v32  ;;  %v850_v32 = vld [vmem:[%s2549_s24 + $0x10] sm:$0xff] }
 0x344   : > { %v932_v34 = vsel %vm855_vm9, %v2040_v33, 0.0 }
 0x345   : > { %933 = vadd.xlane.f32.xlu2 %v932_v34 }
 0x34a   : > { %v1020_v35 = vpop.permute.xlu0 %1019 }
 0x34b   : > { %1962 = vmatmul.msk.f32.vlgmr.msrb.gmra.mxu2 %vm855_vm9, %v1020_v35 }
 0x34c   : > { %1338 = vmatpush.msrb.mxu2 %v850_v32  ;;  %v2106_v32 = vmov 32.0  }
 0x350   : > { %1073 = vrot.lane.b32.xlu1 %v2309_v58, %s2100_s22 }
 0x352   : > { %v1186_v44 = vpop.permute.xlu0 %1185 }
 0x35a   : > { %v1214_v8 = vpop.permute.xlu0 %1213 }
 0x35d   : > { %1183 = vrot.lane.b32.xlu2 %v2309_v58, %s2101_s23 }
 0x3aa   : > { %v931_v36 = vpop.xlane.xlu1 %930 }
 0x3ab   : > { %2041 = vrcp.f32 %v931_v36 }
 0x3af   : > { %v1065_v37 = vpop.xlane.xlu2 %1064 }
 0x3b1   : > { %v2042_v38 = vpop.eup %2041 }
 0x3b2   : > { %v937_v39 = vmul.f32 %v2042_v38, %v2036_v24 }
 0x3b4   : > { %1957 = vmatmul.msk.f32.vlgmr.msra.gmra.mxu3 %vm855_vm9, %v937_v39 }
 0x3b8   : > { %v934_v40 = vpop.xlane.xlu2 %933 }
 0x3b9   : > { %2043 = vrcp.f32 %v934_v40 }
 0x3ba   : > { %2045 = vrcp.f32 %v1065_v37 }
 0x3bf   : > { %v2044_v41 = vpop.eup %2043 }
 0x3c0   : > { %v938_v42 = vmul.f32 %v2044_v41, %v2040_v33  ;;  %v2046_v45 = vpop.eup %2045  ;;  %v1184_v49 = vpop.permute.xlu2 %1183 }
 0x3c1   : > { %v1071_v46 = vmul.f32 %v2046_v45, %v2038_v28 }
 0x3c2   : > { %v1074_v43 = vpop.permute.xlu1 %1073  ;;  %1958 = vmatmul.msk.f32.vlgmr.msrb.gmra.mxu3 %vm855_vm9, %v938_v42 }
 0x3c3   : > { %1094 = vmatpush.msra.mxu3 %v1074_v43 }
 0x3c5   : > { %1969 = vmatpush.xpose.msk.msrb.mxu3 %vm855_vm9, %v1186_v44 }
 0x3ca   : > { %1963 = vmatmul.msk.f32.vlgmr.msra.gmra.mxu3 %vm855_vm9, %v1071_v46 }
 0x3ce   : > { %v1044_v47 = vpop.f32.mrf.mxu2 }
 0x3cf   : > { %v1048_v48 = vmul.f32 0.35355338, %v1044_v47 }
 0x3d1   : > { %v1050_v50 = vadd.f32 %v1048_v48, %v2337_v13 }
 0x3d2   : > { %1970 = vmatmul.msk.f32.vlgmr.msrb.gmra.mxu3 %vm855_vm9, %v1184_v49 }
 0x3d3   : > { %v1054_v51 = vsel %vm855_vm9, %v1050_v50, -inf }
 0x3d4   : > { %1055 = vmax.xlane.f32.xlu1 %v1054_v51 }
 0x3ed   : > { %1099 = vrot.lane.b32.xlu1 %v2313_v60, %s2100_s22  ;;  %s2551_s22 = scalar_lea.vmem %s2519_s8, %s2217_s17 }
 0x3f5   : > { %1265 = vrot.lane.b32.xlu1 %v2309_v58, %s2102_s2 }
 0x3fd   : > { %1378 = vrot.lane.b32.xlu1 %v2313_v60, %s2103_s25 }
 0x405   : > { %1376 = vrot.lane.b32.xlu1 %v2313_v60, %s2104_s27 }
 0x437   : > { %v962_v56 = vpop.f32.mrf.mxu3 }
 0x438   : > { %1967 = vmatmul.msk.f32.vlgmr.msra.gmra.mxu0 %vm855_vm9, %v962_v56 }
 0x445   : > { %v988_v57 = vpop.f32.mrf.mxu3 }
 0x446   : > { %1968 = vmatmul.msk.f32.gmra.mxu0 %vm855_vm9, %v988_v57 }
 0x447   : > { %v1056_v59 = vpop.xlane.xlu1 %1055 }
 0x448   : > { %v1058_v61 = vsub.f32 %v1050_v50, %v1056_v59 }
 0x44a   : > { %v1061_v62 = vmul.f32 1.442695, %v1058_v61 }
 0x44c   : > { %2047 = vpow2.f32 %v1061_v62 }
 0x44d   : > { %v1096_v63 = vpop.f32.mrf.mxu3 }
 0x44e   : > { %1965 = vmatmul.msk.f32.vlgmr.msra.gmra.mxu2 %vm855_vm9, %v1096_v63 }
 0x452   : > { %v2048_v0 = vpop.eup %2047 }
 0x453   : > { %v1066_v1 = vsel %vm855_vm9, %v2048_v0, 0.0 }
 0x454   : > { %1067 = vadd.xlane.f32.xlu2 %v1066_v1 }
 0x455   : > { %v1208_v2 = vpop.f32.mrf.mxu3 }
 0x456   : > { %v1239_v4 = vmul.f32 0.35355338, %v1208_v2 }
 0x458   : > { %v1241_v5 = vadd.f32 %v1239_v4, %v2331_v3 }
 0x45a   : > { %v1243_v6 = vsel %vm855_vm9, %v1241_v5, -inf }
 0x45b   : > { %1244 = vmax.xlane.f32.xlu0 %v1243_v6 }
 0x45f   : > { %v1100_v7 = vpop.permute.xlu1 %1099 }
 0x460   : > { %1120 = vmatpush.msrb.mxu1 %v1100_v7 }
 0x462   : > { %1971 = vmatpush.xpose.msk.msra.mxu1 %vm855_vm9, %v1214_v8 }
 0x467   : > { %v1266_v9 = vpop.permute.xlu1 %1265 }
 0x468   : > { %1286 = vmatpush.msra.mxu3 %v1266_v9 }
 0x46c   : > { %1211 = vrot.lane.b32.xlu2 %v2313_v60, %s2101_s23 }
 0x46f   : > { %v1379_v10 = vpop.permute.xlu1 %1378  ;;  %1350 = vrot.lane.b32.xlu0 %v2309_v58, %s2103_s25  ;;  %s2554_s25 = sld [smem:[#allocation12_spill]] (!%p1989_p5) }
 0x470   : > { %1979 = vmatpush.xpose.msk.msrb.mxu3 %vm855_vm9, %v1379_v10 }
 0x477   : > { %v1377_v30 = vpop.permute.xlu1 %1376 }
 0x4b5   : > { %v2395_v33 = vpop.f32.mrf.mxu0 }
 0x4c3   : > { %v2397_v37 = vpop.f32.mrf.mxu0 }
 0x4c7   : > { %v1068_v11 = vpop.xlane.xlu2 %1067 }
 0x4c8   : > { %2049 = vrcp.f32 %v1068_v11 }
 0x4ce   : > { %v2050_v12 = vpop.eup %2049  ;;  %v1245_v14 = vpop.xlane.xlu0 %1244 }
 0x4cf   : > { %v1249_v15 = vsub.f32 %v1241_v5, %v1245_v14  ;;  %v1072_v16 = vmul.f32 %v2050_v12, %v2048_v0  ;;  %v1212_v18 = vpop.permute.xlu2 %1211 }
 0x4d1   : > { %v1251_v17 = vmul.f32 1.442695, %v1249_v15  ;;  %1964 = vmatmul.msk.f32.vlgmr.msrb.gmra.mxu1 %vm855_vm9, %v1072_v16  ;;  %v1148_v12 = vpop.f32.mrf.mxu2 }
 0x4d2   : > { %v1178_v16 = vadd.f32 %v2395_v33, %v1148_v12 }
 0x4d3   : > { %2051 = vpow2.f32 %v1251_v17 }
 0x4d9   : > { %v2052_v19 = vpop.eup %2051  ;;  %1972 = vmatmul.msk.f32.vlgmr.msra.gmra.mxu1 %vm855_vm9, %v1212_v18  ;;  %v2028_v18 = vld [vmem:[%s2550_s1] ss:$0 sm:$0xff] }
 0x4da   : > { %v1255_v20 = vsel %vm855_vm9, %v2052_v19, 0.0 }
 0x4db   : > { %1256 = vadd.xlane.f32.xlu0 %v1255_v20 }
 0x4e1   : > { %v1351_v21 = vpop.permute.xlu0 %1350 }
 0x4e2   : > { %1977 = vmatpush.xpose.msk.msrb.mxu0 %vm855_vm9, %v1351_v21 }
 0x4ef   : > { %1348 = vrot.lane.b32.xlu0 %v2309_v58, %s2104_s27 }
 0x54e   : > { %v1122_v22 = vpop.f32.mrf.mxu1  ;;  %v1257_v23 = vpop.xlane.xlu0 %1256 }
 0x54f   : > { %2053 = vrcp.f32 %v1257_v23  ;;  %1966 = vmatmul.msk.f32.gmra.mxu2 %vm855_vm9, %v1122_v22 }
 0x555   : > { %v2054_v24 = vpop.eup %2053 }
 0x556   : > { %v1263_v25 = vmul.f32 %v2054_v24, %v2052_v19  ;;  %v1236_v26 = vpop.f32.mrf.mxu1 }
 0x557   : > { %v1240_v27 = vmul.f32 0.35355338, %v1236_v26 }
 0x558   : > { %1973 = vmatmul.msk.f32.vlgmr.msra.gmra.mxu3 %vm855_vm9, %v1263_v25 }
 0x559   : > { %v1242_v28 = vadd.f32 %v1240_v27, %v2337_v13 }
 0x55b   : > { %v1246_v29 = vsel %vm855_vm9, %v1242_v28, -inf }
 0x55c   : > { %1247 = vmax.xlane.f32.xlu2 %v1246_v29 }
 0x560   : > { %1980 = vmatmul.msk.f32.vlgmr.msrb.gmra.mxu3 %vm855_vm9, %v1377_v30 }
 0x561   : > { %v1349_v31 = vpop.permute.xlu0 %1348 }
 0x562   : > { %1978 = vmatmul.msk.f32.vlgmr.msrb.gmra.mxu0 %vm855_vm9, %v1349_v31 }
 0x5cf   : > { %v1248_v34 = vpop.xlane.xlu2 %1247 }
 0x5d0   : > { %v1250_v35 = vsub.f32 %v1242_v28, %v1248_v34 }
 0x5d2   : > { %v1253_v36 = vmul.f32 1.442695, %v1250_v35  ;;  %v1151_v14 = vpop.f32.mrf.mxu2 }
 0x5d3   : > { %v1181_v23 = vadd.f32 %v2397_v37, %v1151_v14 }
 0x5d4   : > { %2055 = vpow2.f32 %v1253_v36 }
 0x5da   : > { %v2056_v38 = vpop.eup %2055 }
 0x5db   : > { %v1288_v39 = vpop.f32.mrf.mxu3  ;;  %v1258_v40 = vsel %vm855_vm9, %v2056_v38, 0.0 }
 0x5dc   : > { %1259 = vadd.xlane.f32.xlu2 %v1258_v40  ;;  %1975 = vmatmul.msk.f32.vlgmr.msrb.gmra.mxu2 %vm855_vm9, %v1288_v39 }
 0x5df   : > { %v1373_v41 = vpop.f32.mrf.mxu0 }
 0x5e0   : > { %v1404_v42 = vmul.f32 0.35355338, %v1373_v41 }
 0x5e2   : > { %v1406_v43 = vadd.f32 %v1404_v42, %v2331_v3 }
 0x5e3   : > { %v1401_v44 = vpop.f32.mrf.mxu3 }
 0x5e4   : > { %v1405_v45 = vmul.f32 0.35355338, %v1401_v44  ;;  %v1408_v46 = vsel %vm855_vm9, %v1406_v43, -inf }
 0x5e5   : > { %1409 = vmax.xlane.f32.xlu0 %v1408_v46 }
 0x5e6   : > { %v1407_v47 = vadd.f32 %v1405_v45, %v2337_v13 }
 0x5e8   : > { %v1411_v48 = vsel %vm855_vm9, %v1407_v47, -inf }
 0x5e9   : > { %1412 = vmax.xlane.f32.xlu1 %v1411_v48  ;;  %v1586_v48 = vld [vmem:[%s2249_s4 + $0x10] sm:$0xff] }
 0x602   : > { %1291 = vrot.lane.b32.xlu1 %v2313_v60, %s2102_s2  ;;  %s2552_s2 = scalar_lea.vmem %s2520_s9, %s2217_s17 }
 0x64f   : > { %v1260_v13 = vpop.xlane.xlu2 %1259 }
 0x658   : > { %v1410_v49 = vpop.xlane.xlu0 %1409 }
 0x659   : > { %v1414_v50 = vsub.f32 %v1406_v43, %v1410_v49  ;;  %v1585_v49 = vld [vmem:[%s2249_s4 + $0x8] sm:$0xff] }
 0x65b   : > { %v1416_v51 = vmul.f32 1.442695, %v1414_v50  ;;  %v1584_v50 = vld [vmem:[%s2249_s4] sm:$0xff] }
 0x65c   : > { %v1413_v52 = vpop.xlane.xlu1 %1412 }
 0x65d   : > { %2057 = vpow2.f32 %v1416_v51  ;;  %v1415_v53 = vsub.f32 %v1407_v47, %v1413_v52  ;;  %v1587_v47 = vld [vmem:[%s2249_s4 + $0x18] sm:$0xff] }
 0x65f   : > { %v1418_v3 = vmul.f32 1.442695, %v1415_v53  ;;  %v1340_v15 = vpop.f32.mrf.mxu2 }
 0x660   : > { %v1346_v17 = vadd.f32 %v1340_v15, %v1178_v16 }
 0x661   : > { %2059 = vpow2.f32 %v1418_v3 }
 0x662   : > { %2061 = vrcp.f32 %v1260_v13 }
 0x663   : > { %v2058_v56 = vpop.eup %2057 }
 0x664   : > { %v1420_v57 = vsel %vm855_vm9, %v2058_v56, 0.0 }
 0x665   : > { %1421 = vadd.xlane.f32.xlu0 %v1420_v57 }
 0x667   : > { %v2060_v59 = vpop.eup %2059 }
 0x668   : > { %v1423_v61 = vsel %vm855_vm9, %v2060_v59, 0.0  ;;  %v2062_v62 = vpop.eup %2061 }
 0x669   : > { %1424 = vadd.xlane.f32.xlu2 %v1423_v61  ;;  %v1264_v63 = vmul.f32 %v2062_v62, %v2056_v38 }
 0x674   : > { %v1292_v0 = vpop.permute.xlu1 %1291 }
 0x675   : > { %1312 = vmatpush.msrb.mxu1 %v1292_v0 }
 0x676   : > { %1974 = vmatmul.msk.f32.vlgmr.msrb.gmra.mxu1 %vm855_vm9, %v1264_v63 }
 0x679   : > { %1430 = vrot.lane.b32.xlu0 %v2309_v58, %s2105_s20 }
 0x681   : > { %1456 = vrot.lane.b32.xlu2 %v2313_v60, %s2105_s20  ;;  %v851_v60 = vld [vmem:[%s2549_s24 + $0x18] sm:$0xff] }
 0x682   : > { %1503 = vmatpush.msra.mxu3 %v851_v60 }
 0x6d8   : > { %v1422_v2 = vpop.xlane.xlu0 %1421 }
 0x6dc   : > { %v1425_v1 = vpop.xlane.xlu2 %1424 }
 0x6dd   : > { %2063 = vrcp.f32 %v1425_v1 }
 0x6de   : > { %2065 = vrcp.f32 %v1422_v2 }
 0x6df   : > { %2067 = vrcp.f32 %v2106_v32 }
 0x6e3   : > { %v2064_v4 = vpop.eup %2063 }
 0x6e4   : > { %v1429_v5 = vmul.f32 %v2064_v4, %v2060_v59  ;;  %v1457_v6 = vpop.permute.xlu2 %1456  ;;  %v2066_v7 = vpop.eup %2065  ;;  %v2029_v4 = vld [vmem:[%s2551_s22] ss:$0 sm:$0xff] }
 0x6e5   : > { %1477 = vmatpush.msra.mxu0 %v1457_v6  ;;  %v1428_v8 = vmul.f32 %v2066_v7, %v2058_v56  ;;  %v2068_v33 = vpop.eup %2067 }
 0x6e6   : > { %1982 = vmatmul.msk.f32.vlgmr.msra.gmra.mxu0 %vm855_vm9, %v1429_v5  ;;  %v1530_v34 = vmul.f32 32.0, %v2068_v33  ;;  %vm1534_vm10 = vweird.f32 %v2068_v33 }
 0x6e8   : > { %v1531_v35 = vsub.f32 1.0, %v1530_v34 }
 0x6ea   : > { %v1532_v36 = vmul.f32 %v2068_v33, %v1531_v35 }
 0x6eb   : > { %v1431_v9 = vpop.permute.xlu0 %1430 }
 0x6ec   : > { %1451 = vmatpush.msra.mxu1 %v1431_v9 }
 0x6ed   : > { %1981 = vmatmul.msk.f32.vlgmr.msra.gmra.mxu1 %vm855_vm9, %v1428_v8  ;;  %v2030_v8 = vld [vmem:[%s2552_s2] ss:$0 sm:$0xff] }
 0x6ee   : > { %1610 = vmatpush.msrb.mxu1 %v1587_v47  ;;  %v2032_v47 = vld [vmem:[%s728_s19] ss:$0 sm:$0xff] }
 0x6f0   : > { %1611 = vmatpush.msrb.mxu1 %v1586_v48 }
 0x6f2   : > { %1612 = vmatpush.msrb.mxu1 %v1585_v49 }
 0x6f3   : > { %v1314_v58 = vpop.f32.mrf.mxu1 }
 0x6f4   : > { %1976 = vmatmul.msk.f32.gmra.mxu2 %vm855_vm9, %v1314_v58  ;;  %1613 = vmatpush.msrb.mxu1 %v1584_v50 }
 0x763   : > { %v1479_v11 = vpop.f32.mrf.mxu0 }
 0x76a   : > { %v1453_v10 = vpop.f32.mrf.mxu1 }
 0x76b   : > { %1983 = vmatmul.msk.f32.vlgmr.msra.gmra.mxu3 %vm855_vm9, %v1453_v10 }
 0x773   : > { %1984 = vmatmul.msk.f32.gmra.mxu3 %vm855_vm9, %v1479_v11 }
 0x777   : > { %v1343_v22 = vpop.f32.mrf.mxu2 }
 0x778   : > { %v1347_v25 = vadd.f32 %v1343_v22, %v1181_v23  ;;  %v1641_v22 = vld [vmem:[%s2259_s28 + $0x10] sm:$0xff]  ;;  %v1640_v23 = vld [vmem:[%s2259_s28 + $0x8] sm:$0xff] }
 0x7ee   : > { %v1505_v19 = vpop.f32.mrf.mxu3 }
 0x7ef   : > { %v1511_v20 = vadd.f32 %v1505_v19, %v1346_v17  ;;  %v1646_v17 = vld [vmem:[%s2259_s28 + $0x38] sm:$0xff]  ;;  %v1644_v19 = vld [vmem:[%s2259_s28 + $0x28] sm:$0xff] }
 0x7f0   : > { %1666 = vmatpush.msra.mxu2 %v1646_v17 }
 0x7f1   : > { %v1517_v21 = vadd.f32 %v2028_v18, %v1511_v20  ;;  %v1643_v20 = vld [vmem:[%s2259_s28 + $0x20] sm:$0xff] }
 0x7f3   : > { %v1519_v24 = vadd.f32 %v1517_v21, %v2296_v54  ;;  %v1533_v54 = vadd.f32 %v2068_v33, %v1532_v36  ;;  %v1642_v21 = vld [vmem:[%s2259_s28 + $0x18] sm:$0xff] }
 0x7f5   : > { %v1523_v26 = vsel %vm818_vm8, %v1519_v24, 0.0  ;;  %v2429_v37 = vsel %vm1534_vm10, %v2068_v33, %v1533_v54 }
 0x7f6   : > { %1524 = vadd.xlane.f32.xlu1 %v1523_v26  ;;  %v1508_v27 = vpop.f32.mrf.mxu3 }
 0x7f7   : > { %v1512_v28 = vadd.f32 %v1508_v27, %v1347_v25  ;;  %v2031_v25 = vld [vmem:[%s720_s6] ss:$0 sm:$0xff] }
 0x7f9   : > { %v1518_v29 = vadd.f32 %v2028_v18, %v1512_v28  ;;  %v1645_v18 = vld [vmem:[%s2259_s28 + $0x30] sm:$0xff] }
 0x7fa   : > { %1667 = vmatpush.msra.mxu2 %v1645_v18  ;;  %v2033_v18 = vld [vmem:[%s731_s21] ss:$0 sm:$0xff]  ;;  %s2553_s21 = sld [smem:[#allocation11_spill]] (!%p1989_p5) }
 0x7fb   : > { %v1520_v30 = vadd.f32 %v1518_v29, %v2300_v55 }
 0x7fc   : > { %1668 = vmatpush.msra.mxu2 %v1644_v19 }
 0x7fd   : > { %v1526_v31 = vsel %vm818_vm8, %v1520_v30, 0.0 }
 0x7fe   : > { %1527 = vadd.xlane.f32.xlu0 %v1526_v31  ;;  %1669 = vmatpush.msra.mxu2 %v1643_v20  ;;  %v2034_v20 = vld [vmem:[%s734_s16] ss:$0 sm:$0xff] }
 0x800   : > { %1670 = vmatpush.msra.mxu2 %v1642_v21 }
 0x802   : > { %1671 = vmatpush.msra.mxu2 %v1641_v22 }
 0x804   : > { %1672 = vmatpush.msra.mxu2 %v1640_v23 }
 0x869   : > { %v1525_v38 = vpop.xlane.xlu1 %1524 }
 0x86a   : > { %v1536_v39 = vmul.f32 %v2429_v37, %v1525_v38 }
 0x86c   : > { %v1538_v55 = vsub.f32 %v1519_v24, %v1536_v39  ;;  %v1639_v24 = vld [vmem:[%s2259_s28] sm:$0xff] }
 0x86d   : > { %1673 = vmatpush.msra.mxu2 %v1639_v24 }
 0x86e   : > { %v1540_v40 = vmul.f32 %v1538_v55, %v1538_v55 }
 0x870   : > { %v1542_v41 = vsel %vm818_vm8, %v1540_v40, 0.0 }
 0x871   : > { %1543 = vadd.xlane.f32.xlu2 %v1542_v41  ;;  %v1528_v42 = vpop.xlane.xlu0 %1527 }
 0x872   : > { %v1537_v43 = vmul.f32 %v2429_v37, %v1528_v42 }
 0x874   : > { %v1539_v44 = vsub.f32 %v1520_v30, %v1537_v43 }
 0x876   : > { %v1541_v45 = vmul.f32 %v1539_v44, %v1539_v44 }
 0x878   : > { %v1545_v46 = vsel %vm818_vm8, %v1541_v45, 0.0 }
 0x879   : > { %1546 = vadd.xlane.f32.xlu1 %v1545_v46 }
 0x8e4   : > { %v1544_v51 = vpop.xlane.xlu2 %1543 }
 0x8e5   : > { %v1548_v52 = vmul.f32 %v1544_v51, %v2429_v37 }
 0x8e7   : > { %v1550_v53 = vadd.f32 1e-12, %v1548_v52 }
 0x8e9   : > { %2069 = vrsqrt.f32 %v1550_v53  ;;  %vm1558_vm12 = vweird.f32 %v1550_v53 }
 0x8ec   : > { %v1547_v3 = vpop.xlane.xlu1 %1546 }
 0x8ed   : > { %v1549_v56 = vmul.f32 %v1547_v3, %v2429_v37 }
 0x8ef   : > { %v2070_v57 = vpop.eup %2069  ;;  %v1551_v59 = vadd.f32 1e-12, %v1549_v56 }
 0x8f0   : > { %v1553_v13 = vmul.f32 %v2070_v57, %v1550_v53  ;;  %vm1559_vm11 = vweird.f32 %v2070_v57 }
 0x8f1   : > { %2071 = vrsqrt.f32 %v1551_v59  ;;  %vm1560_vm13 = vmor %vm1558_vm12, %vm1559_vm11  ;;  %vm1568_vm15 = vweird.f32 %v1551_v59 }
 0x8f2   : > { %v1554_v61 = vmul.f32 %v2070_v57, %v1553_v13 }
 0x8f4   : > { %v1555_v62 = vmul.f32 0.5, %v1554_v61 }
 0x8f6   : > { %v1556_v63 = vsub.f32 1.5, %v1555_v62 }
 0x8f7   : > { %v2072_v0 = vpop.eup %2071 }
 0x8f8   : > { %v1557_v1 = vmul.f32 %v2070_v57, %v1556_v63  ;;  %v1563_v2 = vmul.f32 %v2072_v0, %v1551_v59  ;;  %vm1569_vm14 = vweird.f32 %v2072_v0 }
 0x8f9   : > { %vm1570_vm0 = vmor %vm1568_vm15, %vm1569_vm14 }
 0x8fa   : > { %v1561_v5 = vsel %vm1560_vm13, %v2070_v57, %v1557_v1  ;;  %v1564_v6 = vmul.f32 %v2072_v0, %v1563_v2 }
 0x8fb   : > { %v1572_v7 = vmul.f32 %v1561_v5, %v1538_v55 }
 0x8fc   : > { %v1565_v9 = vmul.f32 0.5, %v1564_v6 }
 0x8fd   : > { %v1577_v58 = vmul.f32 %v2029_v4, %v1572_v7 }
 0x8fe   : > { %v1566_v60 = vsub.f32 1.5, %v1565_v9 }
 0x8ff   : > { %v1582_v10 = vadd.f32 %v2030_v8, %v1577_v58 }
 0x900   : > { %v1567_v11 = vmul.f32 %v2072_v0, %v1566_v60 }
 0x901   : > { %1985 = vmatmul.msk.f32.vlgmr.msrb.gmra.mxu1 %vm818_vm8, %v1582_v10 }
 0x902   : > { %v1571_v12 = vsel %vm1570_vm0, %v2072_v0, %v1567_v11 }
 0x903   : > { %v1573_v14 = vmul.f32 %v1571_v12, %v1539_v44 }
 0x905   : > { %v1578_v15 = vmul.f32 %v2029_v4, %v1573_v14 }
 0x907   : > { %v1583_v16 = vadd.f32 %v2030_v8, %v1578_v15 }
 0x909   : > { %1986 = vmatmul.msk.f32.gmra.mxu1 %vm818_vm8, %v1583_v16 }
 0x97e   : > { %v1615_v26 = vpop.f32.mrf.mxu1 }
 0x97f   : > { %v1616_v27 = vadd.f32 %v2031_v25, %v1615_v26 }
 0x981   : > { %v1621_v28 = vmul.f32 %v1616_v27, %v1616_v27 }
 0x983   : > { %v1623_v29 = vmul.f32 %v1621_v28, %v1616_v27 }
 0x985   : > { %v1625_v30 = vmul.f32 0.044715, %v1623_v29 }
 0x986   : > { %v1618_v31 = vpop.f32.mrf.mxu1 }
 0x987   : > { %v1627_v32 = vadd.f32 %v1625_v30, %v1616_v27  ;;  %v1619_v33 = vadd.f32 %v2031_v25, %v1618_v31 }
 0x989   : > { %v1629_v34 = vmul.f32 0.7978846, %v1627_v32  ;;  %v1622_v35 = vmul.f32 %v1619_v33, %v1619_v33 }
 0x98b   : > { %2073 = vtanh.f32 %v1629_v34  ;;  %v1624_v36 = vmul.f32 %v1622_v35, %v1619_v33 }
 0x98d   : > { %v1626_v54 = vmul.f32 0.044715, %v1624_v36 }
 0x98f   : > { %v1628_v38 = vadd.f32 %v1626_v54, %v1619_v33 }
 0x991   : > { %v2074_v39 = vpop.eup %2073  ;;  %v1630_v55 = vmul.f32 0.7978846, %v1628_v38 }
 0x992   : > { %v1633_v40 = vadd.f32 1.0, %v2074_v39 }
 0x993   : > { %2075 = vtanh.f32 %v1630_v55 }
 0x994   : > { %v1635_v41 = vmul.f32 0.5, %v1633_v40 }
 0x996   : > { %v1637_v42 = vmul.f32 %v1635_v41, %v1616_v27 }
 0x998   : > { %1987 = vmatmul.msk.f32.vlgmr.msra.gmra.mxu2 %vm1651_vm1, %v1637_v42 }
 0x999   : > { %v2076_v43 = vpop.eup %2075 }
 0x99a   : > { %v1634_v44 = vadd.f32 1.0, %v2076_v43 }
 0x99c   : > { %v1636_v45 = vmul.f32 0.5, %v1634_v44 }
 0x99e   : > { %v1638_v46 = vmul.f32 %v1636_v45, %v1619_v33 }
 0x9a0   : > { %1988 = vmatmul.msk.f32.gmra.mxu2 %vm1651_vm1, %v1638_v46 }
 0xa1b   : > { %v1675_v48 = vpop.f32.mrf.mxu2 }
 0xa1c   : > { %v1676_v49 = vadd.f32 %v2032_v47, %v1675_v48 }
 0xa1e   : > { %v1681_v50 = vadd.f32 %v1676_v49, %v1582_v10 }
 0xa20   : > { %v1685_v51 = vsel %vm818_vm8, %v1681_v50, 0.0 }
 0xa21   : > { %1686 = vadd.xlane.f32.xlu0 %v1685_v51 }
 0xa23   : > { %v1678_v52 = vpop.f32.mrf.mxu2 }
 0xa24   : > { %v1679_v53 = vadd.f32 %v2032_v47, %v1678_v52 }
 0xa26   : > { %v1682_v3 = vadd.f32 %v1679_v53, %v1583_v16 }
 0xa28   : > { %v1688_v56 = vsel %vm818_vm8, %v1682_v3, 0.0 }
 0xa29   : > { %1689 = vadd.xlane.f32.xlu1 %v1688_v56 }
 0xa94   : > { %v1687_v57 = vpop.xlane.xlu0 %1686 }
 0xa95   : > { %v1691_v59 = vmul.f32 %v1687_v57, %v2429_v37 }
 0xa97   : > { %v1693_v13 = vsub.f32 %v1681_v50, %v1691_v59 }
 0xa99   : > { %v1695_v61 = vmul.f32 %v1693_v13, %v1693_v13 }
 0xa9b   : > { %v1697_v62 = vsel %vm818_vm8, %v1695_v61, 0.0 }
 0xa9c   : > { %v1690_v63 = vpop.xlane.xlu1 %1689  ;;  %1698 = vadd.xlane.f32.xlu0 %v1697_v62 }
 0xa9d   : > { %v1692_v0 = vmul.f32 %v1690_v63, %v2429_v37 }
 0xa9f   : > { %v1694_v1 = vsub.f32 %v1682_v3, %v1692_v0 }
 0xaa1   : > { %v1696_v2 = vmul.f32 %v1694_v1, %v1694_v1 }
 0xaa3   : > { %v1700_v4 = vsel %vm818_vm8, %v1696_v2, 0.0 }
 0xaa4   : > { %1701 = vadd.xlane.f32.xlu2 %v1700_v4 }
 0xb0f   : > { %v1699_v5 = vpop.xlane.xlu0 %1698 }
 0xb10   : > { %v1703_v6 = vmul.f32 %v1699_v5, %v2429_v37 }
 0xb12   : > { %v1705_v7 = vadd.f32 1e-12, %v1703_v6 }
 0xb14   : > { %2077 = vrsqrt.f32 %v1705_v7  ;;  %vm1713_vm3 = vweird.f32 %v1705_v7 }
 0xb17   : > { %v1702_v8 = vpop.xlane.xlu2 %1701 }
 0xb18   : > { %v1704_v9 = vmul.f32 %v1702_v8, %v2429_v37 }
 0xb1a   : > { %v2078_v58 = vpop.eup %2077  ;;  %v1706_v60 = vadd.f32 1e-12, %v1704_v9 }
 0xb1b   : > { %v1708_v10 = vmul.f32 %v2078_v58, %v1705_v7  ;;  %vm1714_vm2 = vweird.f32 %v2078_v58 }
 0xb1c   : > { %2079 = vrsqrt.f32 %v1706_v60  ;;  %vm1715_vm4 = vmor %vm1713_vm3, %vm1714_vm2  ;;  %vm1723_vm6 = vweird.f32 %v1706_v60 }
 0xb1d   : > { %v1709_v11 = vmul.f32 %v2078_v58, %v1708_v10 }
 0xb1f   : > { %v1710_v12 = vmul.f32 0.5, %v1709_v11 }
 0xb21   : > { %v1711_v14 = vsub.f32 1.5, %v1710_v12 }
 0xb22   : > { %v2080_v15 = vpop.eup %2079 }
 0xb23   : > { %v1712_v16 = vmul.f32 %v2078_v58, %v1711_v14  ;;  %v1718_v17 = vmul.f32 %v2080_v15, %v1706_v60  ;;  %vm1724_vm5 = vweird.f32 %v2080_v15 }
 0xb24   : > { %vm1725_vm7 = vmor %vm1723_vm6, %vm1724_vm5 }
 0xb25   : > { %v1716_v37 = vsel %vm1715_vm4, %v2078_v58, %v1712_v16  ;;  %v1719_v19 = vmul.f32 %v2080_v15, %v1718_v17 }
 0xb26   : > { %v1727_v21 = vmul.f32 %v1716_v37, %v1693_v13 }
 0xb27   : > { %v1720_v22 = vmul.f32 0.5, %v1719_v19 }
 0xb28   : > { %v1732_v23 = vmul.f32 %v2033_v18, %v1727_v21 }
 0xb29   : > { %v1721_v24 = vsub.f32 1.5, %v1720_v22 }
 0xb2a   : > { %v1737_v25 = vadd.f32 %v2034_v20, %v1732_v23 }
 0xb2b   : > { %v1722_v26 = vmul.f32 %v2080_v15, %v1721_v24 }
 0xb2c   : > { %1739 = vst.msk [vmem:[#allocation2] sm:$0xff] %vm818_vm8, %v1737_v25 }
 0xb2d   : > { %v1726_v27 = vsel %vm1725_vm7, %v2080_v15, %v1722_v26 }
 0xb2e   : > { %v1728_v28 = vmul.f32 %v1726_v27, %v1694_v1 }
 0xb30   : > { %v1733_v29 = vmul.f32 %v2033_v18, %v1728_v28  ;;  %1744 = sbr.rel (%p1989_p5) target bundleno = 3034 (0xbda), region = 100 }
 0xb32   : > { %v1738_v30 = vadd.f32 %v2034_v20, %v1733_v29 }
 0xb34   : > { %1740 = vst.msk [vmem:[#allocation2 + $0x8] sm:$0xff] %vm818_vm8, %v1738_v30 }
 0xb35   : > { %v1753_v31 = vld [vmem:[%s2553_s21 + $0x18] sm:$0xff]  ;;  %v1752_v32 = vld [vmem:[%s2553_s21 + $0x10] sm:$0xff]  ;;  %v1746_v33 = vrot.slane %v1738_v30, 7  ;;  %v1751_v34 = vld [vmem:[%s2553_s21 + $0x8] sm:$0xff]  ;;  %vm1748_vm9 = vcmask 1040384  }
 0xb36   : > { %1773 = vmatpush.msra.mxu0 %v1753_v31  ;;  %v1750_v35 = vld [vmem:[%s2553_s21] sm:$0xff]  ;;  %v2081_v54 = vld [vmem:[#allocation3] ss:$0 sm:$0xff] }
 0xb37   : > { %v1749_v36 = vsel %vm1748_vm9, %v1737_v25, %v1746_v33 }
 0xb38   : > { %1774 = vmatpush.msra.mxu0 %v1752_v32 }
 0xb3a   : > { %1775 = vmatpush.msra.mxu0 %v1751_v34 }
 0xb3c   : > { %1776 = vmatpush.msra.mxu0 %v1750_v35 }
 0xb3d   : > { %1990 = vmatmul.msk.f32.vlgmr.msra.gmra.mxu0 %vm818_vm8, %v1749_v36  ;;  %vm1800_vm8 = vcmask 1024  }
 0xbba   : > { %v1778_v38 = vpop.f32.mrf.mxu0 }
 0xbbb   : > { %v1779_v39 = vadd.f32 %v2081_v54, %v1778_v38 }
 0xbbd   : > { %v1991_v55 = vmul.f32 -1.442695, %v1779_v39 }
 0xbbf   : > { %2082 = vpow2.f32 %v1991_v55 }
 0xbc5   : > { %v2083_v40 = vpop.eup %2082 }
 0xbc6   : > { %v1784_v41 = vadd.f32 1.0, %v2083_v40 }
 0xbc8   : > { %2084 = vrcp.f32 %v1784_v41  ;;  %v1796_v45 = vand.u32 2147483648, %v1784_v41  ;;  %v1794_v47 = vand.u32 2147483647, %v1784_v41  ;;  %vm1790_vm11 = vweird.f32 %v1784_v41 }
 0xbca   : > { %v1797_v49 = vor.u32 1.1754944e-38, %v1796_v45  ;;  %vm1795_vm13 = vcmp.eq.f32.partialorder %v1794_v47, 8.507059e+37 }
 0xbce   : > { %v2085_v42 = vpop.eup %2084 }
 0xbcf   : > { %v1786_v43 = vmul.f32 %v2085_v42, %v1784_v41  ;;  %vm1791_vm10 = vweird.f32 %v2085_v42 }
 0xbd0   : > { %vm1792_vm12 = vmor %vm1790_vm11, %vm1791_vm10 }
 0xbd1   : > { %v1787_v44 = vsub.f32 1.0, %v1786_v43 }
 0xbd3   : > { %v1788_v46 = vmul.f32 %v2085_v42, %v1787_v44 }
 0xbd5   : > { %v1789_v48 = vadd.f32 %v2085_v42, %v1788_v46 }
 0xbd7   : > { %v1793_v50 = vsel %vm1792_vm12, %v2085_v42, %v1789_v48 }
 0xbd8   : > { %v1798_v51 = vsel %vm1795_vm13, %v1797_v49, %v1793_v50 }
 0xbd9   : > { %1801 = vst.msk [vmem:[%s2554_s25] sm:$0x3] %vm1800_vm8, %v1798_v51 }
 0xbda PF: > { %s2555_s27 = sld [smem:[#allocation4_spill]] }
 0xbe0   : > { %s30_s29 = sadd.s32 1, %s2555_s27  }
 0xbe1   : > { %p27_p6 = scmp.ge.s32.totalorder %s30_s29, 4  }
 0xbe3   :  { %29 = sbr.rel (!%p27_p6) target bundleno = 8 (0x8), region = 159 }

</bundles_post_ra>
